<compile_context>
chip_gen: v5e
topology: v5e:2x2
jax: 0.10.0
libtpu: 0.0.40
codegen_flags: <defaults>
</compile_context>

<pallas_src>
import jax
import jax.numpy as jnp
from jax import lax
from jax.experimental import pallas as pl
from jax.experimental.pallas import tpu as pltpu

BN_EPS = 1e-5
NEG_SLOPE = 0.2
LANE = 128


def _round_up(x, m):
    return (x + m - 1) // m * m


def _vmem_capacity_bytes():
    """Physical VMEM per TensorCore, with a conservative (v7x) fallback."""
    try:
        info = pltpu.get_tpu_info()
        for attr in ("vmem_capacity_bytes", "vmem_bytes", "vmem_size_bytes"):
            v = getattr(info, attr, None)
            if v:
                return int(v)
    except Exception:  # noqa: BLE001 - query is best-effort only
        pass
    return 64 * 1024 * 1024


def _largest_divisor_leq(n, cap):
    best = 1
    for d in range(1, n + 1):
        if n % d == 0 and d <= cap:
            best = d
    return best


def _pick_tile_rows(n_batch, ho, wo, hs, ws, cg, coutp, budget_bytes,
                    max_tile_rows):
    """Largest h-tile (divisor of Ho) whose pass-1 working set fits the budget."""
    bpe = 2                                       # bf16 streaming dtype
    fixed = 2 * hs * ws * cg * bpe                # resident image (double buffered)
    fixed += 4 * cg * coutp * bpe                 # weight taps (single buffered)
    fixed += 2 * 8 * coutp * 4                    # stats output block
    per_row = 2 * wo * coutp * 4                  # conv output block (double buffered)
    per_row += wo * coutp * 4                     # f32 accumulator value
    per_row += 4 * wo * cg * bpe                  # per-tap patch temporaries
    cap = max(1, (budget_bytes - fixed) // per_row)
    if max_tile_rows is not None:
        cap = min(cap, max_tile_rows)
    th = _largest_divisor_leq(ho, min(cap, ho))
    # Keep at least two grid tiles so both v7x TensorCores get balanced work.
    while n_batch * (ho // th) < 2 and th > 1:
        th = _largest_divisor_leq(ho, th - 1)
    return th


# --------- Pass 1: conv tile (4 accumulated MXU matmuls) + partial BN stats --
def conv_stats_kernel(xs_ref, w_ref, conv_ref, stats_ref):
    # xs_ref   : (1, Hs, Ws, Cg)     bf16  space-to-depth input, resident per image
    # w_ref    : (4, Cg, Coutp)      bf16  the 4 taps of the equivalent k2s1 conv
    # conv_ref : (1, TH, Wo, Coutp)  f32   raw conv tile (consumed by pass 2)
    # stats_ref: (8, Coutp)          f32   row 0 = sum, row 1 = centered sum-sq
    h = pl.program_id(1)
    _, th, wo, coutp = conv_ref.shape
    cg = xs_ref.shape[3]

    acc = None
    for t in range(4):                            # tap (a, b): rows +a, cols +b
        a, b = t // 2, t % 2
        patch = xs_ref[0, pl.ds(h * th + a, th), pl.ds(b, wo), :]
        contrib = jnp.dot(patch.reshape(th * wo, cg), w_ref[t],
                          preferred_element_type=jnp.float32)
        acc = contrib if acc is None else acc + contrib

    conv_ref[...] = acc.reshape(1, th, wo, coutp)

    # Per-tile *centered* statistics; tiles are merged with Chan's parallel
    # variance formula in the wrapper (avoids E[x^2]-E[x]^2 cancellation).
    s1 = jnp.sum(acc, axis=0, keepdims=True)                      # (1, Coutp)
    mu = s1 * (1.0 / (th * wo))
    d = acc - mu
    m2 = jnp.sum(d * d, axis=0, keepdims=True)                    # (1, Coutp)
    row = lax.broadcasted_iota(jnp.int32, (8, coutp), 0)
    stats_ref[...] = jnp.where(
        row == 0, jnp.broadcast_to(s1, (8, coutp)),
        jnp.where(row == 1, jnp.broadcast_to(m2, (8, coutp)), 0.0))


# --------- Pass 2: elementwise BN affine + LeakyReLU (no matmul recompute) ---
def bn_act_kernel(conv_ref, scale_ref, shift_ref, out_ref):
    y = conv_ref[...] * scale_ref[...] + shift_ref[...]
    out_ref[...] = jnp.where(y >= 0, y, NEG_SLOPE * y).astype(out_ref.dtype)


def encoder_layer_2d(x, weight, gamma, beta, *, stride=2, padding=1,
                     compute_dtype=jnp.bfloat16, out_dtype=jnp.float32,
                     max_tile_rows=None, channels_last_output=False):
    """EncoderLayer2D forward.  x: (N, Cin, H, W) NCHW f32,
    weight: (Cout, Cin, 4, 4), gamma/beta: (Cout,).  Returns NCHW (or NHWC)."""
    N, Cin, H, W = x.shape
    Cout, wc, Kh, Kw = weight.shape
    assert wc == Cin and Kh == 4 and Kw == 4 and stride == 2, (
        "kernel specializes the module defaults: kernel_size=4, stride=2")
    assert (H + 2 * padding) % 2 == 0 and (W + 2 * padding) % 2 == 0

    Hs, Ws = (H + 2 * padding) // 2, (W + 2 * padding) // 2   # space-to-depth dims
    Ho, Wo = Hs - 1, Ws - 1                                    # conv output dims
    M = N * Ho * Wo
    Cg = 4 * Cin
    # Lane-dense output channels; 256-aligned fills the 2x256 MXU of v6e/v7x.
    Coutp = _round_up(Cout, 256 if Cout >= 256 else LANE)

    # ---- cheap glue: pad + 2x2 space-to-depth (~1x input HBM traffic) -------
    xs = jnp.transpose(x, (0, 2, 3, 1))
    xs = jnp.pad(xs, ((0, 0), (padding, padding), (padding, padding), (0, 0)))
    xs = xs.reshape(N, Hs, 2, Ws, 2, Cin).transpose(0, 1, 3, 2, 4, 5)
    xs = xs.reshape(N, Hs, Ws, Cg).astype(compute_dtype)

    # ---- weight -> 4 taps of the equivalent k2s1 conv ------------------------
    # w_taps[a*2+b, (da*2+db)*Cin+cin, cout] = weight[cout, cin, 2a+da, 2b+db]
    w6 = weight.reshape(Cout, Cin, 2, 2, 2, 2)
    w_taps = jnp.transpose(w6, (2, 4, 3, 5, 1, 0)).reshape(4, Cg, Cout)
    w_taps = jnp.pad(w_taps, ((0, 0), (0, 0), (0, Coutp - Cout)))
    w_taps = w_taps.astype(compute_dtype)

    # ---- per-generation VMEM budget & tile choice ----------------------------
    vmem_cap = _vmem_capacity_bytes()          # 64 MiB (v7x) .. 128 MiB (v5e/v6e)
    vmem_limit = min(int(vmem_cap * 0.75), 100 * 1024 * 1024)
    TH = _pick_tile_rows(N, Ho, Wo, Hs, Ws, Cg, Coutp,
                         int(vmem_limit * 0.85), max_tile_rows)
    num_h = Ho // TH
    num_tiles = N * num_h

    cparams = pltpu.CompilerParams(
        dimension_semantics=("parallel", "parallel"),  # v7x: shard tiles over 2 TCs
        vmem_limit_bytes=vmem_limit)

    in_bytes = jnp.dtype(compute_dtype).itemsize
    out_bytes = jnp.dtype(out_dtype).itemsize
    flops_conv = 2 * M * (4 * Cg) * Coutp

    conv_block = (1, TH, Wo, Coutp)
    conv_spec = pl.BlockSpec(conv_block, lambda n, h: (n, h, 0, 0))

    def _run(single_buffer_resident):
        resident = (dict(pipeline_mode=pl.Buffered(1))
                    if single_buffer_resident else {})
        xs_spec = pl.BlockSpec((1, Hs, Ws, Cg), lambda n, h: (n, 0, 0, 0))
        w_spec = pl.BlockSpec((4, Cg, Coutp), lambda n, h: (0, 0, 0), **resident)
        stats_spec = pl.BlockSpec((8, Coutp), lambda n, h: (n * num_h + h, 0))

        # ----- pass 1: conv (MXU) + per-tile partial statistics ---------------
        conv, part_stats = pl.pallas_call(
            conv_stats_kernel,
            out_shape=(jax.ShapeDtypeStruct((N, Ho, Wo, Coutp), jnp.float32),
                       jax.ShapeDtypeStruct((num_tiles * 8, Coutp), jnp.float32)),
            grid=(N, num_h),
            in_specs=[xs_spec, w_spec],
            out_specs=(conv_spec, stats_spec),
            compiler_params=cparams,
            cost_estimate=pl.CostEstimate(
                flops=flops_conv + 6 * M * Coutp,
                transcendentals=0,
                bytes_accessed=(N * Hs * Ws * Cg + 4 * Cg * Coutp) * in_bytes
                               + (M + num_tiles * 8) * Coutp * 4),
        )(xs, w_taps)

        # ----- tiny cross-tile reduction + BN parameter folding (pure JAX) ----
        part = part_stats.reshape(num_tiles, 8, Coutp)
        s1, m2 = part[:, 0, :], part[:, 1, :]
        cnt = TH * Wo
        mean = jnp.sum(s1, axis=0) / M
        mu_t = s1 / cnt
        var = (jnp.sum(m2, axis=0)
               + cnt * jnp.sum((mu_t - mean) ** 2, axis=0)) / M
        inv_std = lax.rsqrt(var + BN_EPS)
        gamma_p = jnp.pad(gamma.astype(jnp.float32), (0, Coutp - Cout))
        beta_p = jnp.pad(beta.astype(jnp.float32), (0, Coutp - Cout))
        scale = (gamma_p * inv_std).reshape(1, 1, 1, Coutp)
        shift = (beta_p - mean * gamma_p * inv_std).reshape(1, 1, 1, Coutp)
        # TODO(synk): BatchNorm2d running_mean/running_var buffer updates
        # (training-mode side effects) are not produced; the forward output
        # does not depend on them.

        # ----- pass 2: elementwise normalize + LeakyReLU -----------------------
        param_spec = pl.BlockSpec((1, 1, 1, Coutp), lambda n, h: (0, 0, 0, 0),
                                  **resident)
        out4 = pl.pallas_call(
            bn_act_kernel,
            out_shape=jax.ShapeDtypeStruct((N, Ho, Wo, Coutp), out_dtype),
            grid=(N, num_h),
            in_specs=[conv_spec, param_spec, param_spec],
            out_specs=conv_spec,
            compiler_params=cparams,
            cost_estimate=pl.CostEstimate(
                flops=4 * M * Coutp,
                transcendentals=0,
                bytes_accessed=M * Coutp * (4 + out_bytes) + 2 * Coutp * 4),
        )(conv, scale, shift)
        return out4

    try:
        out4 = _run(single_buffer_resident=True)
    except Exception:  # older JAX without Buffered(1): default double buffering
        out4 = _run(single_buffer_resident=False)

    out = out4[..., :Cout]
    if channels_last_output:
        return out                                 # NHWC, skips the layout pass
    return jnp.transpose(out, (0, 3, 1, 2))        # NCHW to match PyTorch


def _reference(x, weight, gamma, beta, *, stride=2, padding=1,
               compute_dtype=jnp.bfloat16):
    """Pure-JAX reference mirroring PyTorch semantics (training-mode BN).
    Conv inputs are cast to the kernel's compute dtype (bf16 with f32
    accumulation) so the comparison isolates the kernel logic."""
    conv = lax.conv_general_dilated(
        x.astype(compute_dtype), weight.astype(compute_dtype),
        window_strides=(stride, stride),
        padding=((padding, padding), (padding, padding)),
        dimension_numbers=("NCHW", "OIHW", "NCHW"),
        preferred_element_type=jnp.float32)
    mean = jnp.mean(conv, axis=(0, 2, 3), keepdims=True)
    var = jnp.mean((conv - mean) ** 2, axis=(0, 2, 3), keepdims=True)
    y = (conv - mean) * lax.rsqrt(var + BN_EPS)
    y = y * gamma.reshape(1, -1, 1, 1) + beta.reshape(1, -1, 1, 1)
    return jnp.where(y >= 0, y, NEG_SLOPE * y)


if __name__ == "__main__":
    # batch=2, Cin=4, Cout=8, spatial 32x32 -> Ho=Wo=16.  max_tile_rows=8 gives
    # a (2, 2) grid (4 tiles), exercising the resident-image input, the h-tile
    # loop, and the cross-tile Chan variance combine.
    N, Cin, Cout, H, W = 2, 4, 8, 32, 32
    key = jax.random.PRNGKey(0)
    kx, kw, kg, kb = jax.random.split(key, 4)
    x = jax.random.normal(kx, (N, Cin, H, W), dtype=jnp.float32)
    weight = jax.random.normal(kw, (Cout, Cin, 4, 4), dtype=jnp.float32) * 0.1
    gamma = 1.0 + 0.1 * jax.random.normal(kg, (Cout,), dtype=jnp.float32)
    beta = 0.1 * jax.random.normal(kb, (Cout,), dtype=jnp.float32)

    out = encoder_layer_2d(x, weight, gamma, beta, max_tile_rows=8)
    out = jax.block_until_ready(out)

    ref = jax.block_until_ready(_reference(x, weight, gamma, beta))
    assert out.shape == (N, Cout, H // 2, W // 2), out.shape
    max_err = float(jnp.max(jnp.abs(out - ref)))
    assert max_err < 2e-3, max_err
    print("KERNEL_OK")
</pallas_src>

<mosaic_0001>
module attributes {stable_mosaic.version = 11 : i64} {
  func.func @conv_stats_kernel(%arg0: i32, %arg1: i32, %arg2: memref<1x17x17x16xbf16, #tpu.memory_space<vmem>>, %arg3: memref<4x16x128xbf16, #tpu.memory_space<vmem>>, %arg4: memref<1x8x16x128xf32, #tpu.memory_space<vmem>>, %arg5: memref<8x128xf32, #tpu.memory_space<vmem>>) attributes {dimension_semantics = [#tpu.dimension_semantics<parallel>, #tpu.dimension_semantics<parallel>], iteration_bounds = array<i64: 2, 2>, scalar_prefetch = 0 : i64, scratch_operands = 0 : i64, tpu.core_type = #tpu.core_type<tc>, window_params = [{transform_indices = @transform_0, window_bounds = array<i64: 1, 17, 17, 16>}, {pipeline_mode = #tpu.pipeline_mode<synchronous>, transform_indices = @transform_1, window_bounds = array<i64: 4, 16, 128>}, {transform_indices = @transform_2, window_bounds = array<i64: 1, 8, 16, 128>}, {transform_indices = @transform_3, window_bounds = array<i64: 8, 128>}]} {
    %c8_i32 = arith.constant 8 : i32
    %0 = arith.muli %arg1, %c8_i32 : i32
    %c0_i32 = arith.constant 0 : i32
    %1 = arith.addi %0, %c0_i32 : i32
    %c0 = arith.constant 0 : index
    %2 = arith.index_cast %1 : i32 to index
    %c0_0 = arith.constant 0 : index
    %c0_1 = arith.constant 0 : index
    %3 = vector.load %arg2[%c0, %2, %c0_0, %c0_1] : memref<1x17x17x16xbf16, #tpu.memory_space<vmem>>, vector<1x8x16x16xbf16>
    %4 = vector.shape_cast %3 : vector<1x8x16x16xbf16> to vector<8x16x16xbf16>
    %5 = vector.shape_cast %4 : vector<8x16x16xbf16> to vector<128x16xbf16>
    %c0_2 = arith.constant 0 : index
    %c0_3 = arith.constant 0 : index
    %c0_4 = arith.constant 0 : index
    %6 = vector.load %arg3[%c0_2, %c0_3, %c0_4] : memref<4x16x128xbf16, #tpu.memory_space<vmem>>, vector<1x16x128xbf16>
    %7 = vector.shape_cast %6 : vector<1x16x128xbf16> to vector<16x128xbf16>
    %cst = arith.constant dense<0.000000e+00> : vector<128x128xf32>
    %8 = tpu.matmul %5, %7, %cst {dimension_numbers = #tpu.dot_dimension_numbers<[1], [0], [0], [1], [0, 0, 1, 1], [], []>} : vector<128x16xbf16>, vector<16x128xbf16>, vector<128x128xf32> -> vector<128x128xf32>
    %c8_i32_5 = arith.constant 8 : i32
    %9 = arith.muli %arg1, %c8_i32_5 : i32
    %c0_i32_6 = arith.constant 0 : i32
    %10 = arith.addi %9, %c0_i32_6 : i32
    %c0_7 = arith.constant 0 : index
    %11 = arith.index_cast %10 : i32 to index
    %c1 = arith.constant 1 : index
    %c0_8 = arith.constant 0 : index
    %12 = vector.load %arg2[%c0_7, %11, %c1, %c0_8] : memref<1x17x17x16xbf16, #tpu.memory_space<vmem>>, vector<1x8x16x16xbf16>
    %13 = vector.shape_cast %12 : vector<1x8x16x16xbf16> to vector<8x16x16xbf16>
    %14 = vector.shape_cast %13 : vector<8x16x16xbf16> to vector<128x16xbf16>
    %c1_9 = arith.constant 1 : index
    %c0_10 = arith.constant 0 : index
    %c0_11 = arith.constant 0 : index
    %15 = vector.load %arg3[%c1_9, %c0_10, %c0_11] : memref<4x16x128xbf16, #tpu.memory_space<vmem>>, vector<1x16x128xbf16>
    %16 = vector.shape_cast %15 : vector<1x16x128xbf16> to vector<16x128xbf16>
    %cst_12 = arith.constant dense<0.000000e+00> : vector<128x128xf32>
    %17 = tpu.matmul %14, %16, %cst_12 {dimension_numbers = #tpu.dot_dimension_numbers<[1], [0], [0], [1], [0, 0, 1, 1], [], []>} : vector<128x16xbf16>, vector<16x128xbf16>, vector<128x128xf32> -> vector<128x128xf32>
    %18 = arith.addf %8, %17 : vector<128x128xf32>
    %c8_i32_13 = arith.constant 8 : i32
    %19 = arith.muli %arg1, %c8_i32_13 : i32
    %c1_i32 = arith.constant 1 : i32
    %20 = arith.addi %19, %c1_i32 : i32
    %c0_14 = arith.constant 0 : index
    %21 = arith.index_cast %20 : i32 to index
    %c0_15 = arith.constant 0 : index
    %c0_16 = arith.constant 0 : index
    %22 = vector.load %arg2[%c0_14, %21, %c0_15, %c0_16] : memref<1x17x17x16xbf16, #tpu.memory_space<vmem>>, vector<1x8x16x16xbf16>
    %23 = vector.shape_cast %22 : vector<1x8x16x16xbf16> to vector<8x16x16xbf16>
    %24 = vector.shape_cast %23 : vector<8x16x16xbf16> to vector<128x16xbf16>
    %c2 = arith.constant 2 : index
    %c0_17 = arith.constant 0 : index
    %c0_18 = arith.constant 0 : index
    %25 = vector.load %arg3[%c2, %c0_17, %c0_18] : memref<4x16x128xbf16, #tpu.memory_space<vmem>>, vector<1x16x128xbf16>
    %26 = vector.shape_cast %25 : vector<1x16x128xbf16> to vector<16x128xbf16>
    %cst_19 = arith.constant dense<0.000000e+00> : vector<128x128xf32>
    %27 = tpu.matmul %24, %26, %cst_19 {dimension_numbers = #tpu.dot_dimension_numbers<[1], [0], [0], [1], [0, 0, 1, 1], [], []>} : vector<128x16xbf16>, vector<16x128xbf16>, vector<128x128xf32> -> vector<128x128xf32>
    %28 = arith.addf %18, %27 : vector<128x128xf32>
    %c8_i32_20 = arith.constant 8 : i32
    %29 = arith.muli %arg1, %c8_i32_20 : i32
    %c1_i32_21 = arith.constant 1 : i32
    %30 = arith.addi %29, %c1_i32_21 : i32
    %c0_22 = arith.constant 0 : index
    %31 = arith.index_cast %30 : i32 to index
    %c1_23 = arith.constant 1 : index
    %c0_24 = arith.constant 0 : index
    %32 = vector.load %arg2[%c0_22, %31, %c1_23, %c0_24] : memref<1x17x17x16xbf16, #tpu.memory_space<vmem>>, vector<1x8x16x16xbf16>
    %33 = vector.shape_cast %32 : vector<1x8x16x16xbf16> to vector<8x16x16xbf16>
    %34 = vector.shape_cast %33 : vector<8x16x16xbf16> to vector<128x16xbf16>
    %c3 = arith.constant 3 : index
    %c0_25 = arith.constant 0 : index
    %c0_26 = arith.constant 0 : index
    %35 = vector.load %arg3[%c3, %c0_25, %c0_26] : memref<4x16x128xbf16, #tpu.memory_space<vmem>>, vector<1x16x128xbf16>
    %36 = vector.shape_cast %35 : vector<1x16x128xbf16> to vector<16x128xbf16>
    %cst_27 = arith.constant dense<0.000000e+00> : vector<128x128xf32>
    %37 = tpu.matmul %34, %36, %cst_27 {dimension_numbers = #tpu.dot_dimension_numbers<[1], [0], [0], [1], [0, 0, 1, 1], [], []>} : vector<128x16xbf16>, vector<16x128xbf16>, vector<128x128xf32> -> vector<128x128xf32>
    %38 = arith.addf %28, %37 : vector<128x128xf32>
    %39 = vector.shape_cast %38 : vector<128x128xf32> to vector<1x8x16x128xf32>
    %c0_28 = arith.constant 0 : index
    %c0_29 = arith.constant 0 : index
    %c0_30 = arith.constant 0 : index
    %c0_31 = arith.constant 0 : index
    %40 = vector.load %arg4[%c0_28, %c0_29, %c0_30, %c0_31] : memref<1x8x16x128xf32, #tpu.memory_space<vmem>>, vector<1x8x16x128xf32>
    tpu.vector_store %arg4[%c0_28, %c0_29, %c0_30, %c0_31], %39 {strides = array<i32>} : memref<1x8x16x128xf32, #tpu.memory_space<vmem>>, vector<1x8x16x128xf32>,
    %cst_32 = arith.constant dense<0.000000e+00> : vector<128xf32>
    %41 = vector.multi_reduction <add>, %38, %cst_32 [0] : vector<128x128xf32> to vector<128xf32>
    %42 = vector.shape_cast %41 : vector<128xf32> to vector<1x128xf32>
    %cst_33 = arith.constant 7.812500e-03 : f32
    %43 = vector.broadcast %cst_33 : f32 to vector<1x128xf32>
    %44 = arith.mulf %42, %43 : vector<1x128xf32>
    %45 = vector.broadcast %44 : vector<1x128xf32> to vector<128x128xf32>
    %46 = arith.subf %38, %45 : vector<128x128xf32>
    %47 = arith.mulf %46, %46 : vector<128x128xf32>
    %cst_34 = arith.constant dense<0.000000e+00> : vector<128xf32>
    %48 = vector.multi_reduction <add>, %47, %cst_34 [0] : vector<128x128xf32> to vector<128xf32>
    %49 = vector.shape_cast %48 : vector<128xf32> to vector<1x128xf32>
    %50 = tpu.iota {dimensions = array<i32: 0>} : vector<8x128xi32>
    %c0_i32_35 = arith.constant 0 : i32
    %51 = vector.broadcast %c0_i32_35 : i32 to vector<8x128xi32>
    %52 = arith.cmpi eq, %50, %51 : vector<8x128xi32>
    %53 = vector.shape_cast %42 : vector<1x128xf32> to vector<1x128xf32>
    %54 = vector.broadcast %53 : vector<1x128xf32> to vector<8x128xf32>
    %c1_i32_36 = arith.constant 1 : i32
    %55 = vector.broadcast %c1_i32_36 : i32 to vector<8x128xi32>
    %56 = arith.cmpi eq, %50, %55 : vector<8x128xi32>
    %57 = vector.shape_cast %49 : vector<1x128xf32> to vector<1x128xf32>
    %58 = vector.broadcast %57 : vector<1x128xf32> to vector<8x128xf32>
    %cst_37 = arith.constant 0.000000e+00 : f32
    %59 = vector.broadcast %cst_37 : f32 to vector<8x128xf32>
    %60 = arith.select %56, %58, %59 : vector<8x128xi1>, vector<8x128xf32>
    %61 = arith.select %52, %54, %60 : vector<8x128xi1>, vector<8x128xf32>
    %c0_38 = arith.constant 0 : index
    %c0_39 = arith.constant 0 : index
    %62 = vector.load %arg5[%c0_38, %c0_39] : memref<8x128xf32, #tpu.memory_space<vmem>>, vector<8x128xf32>
    tpu.vector_store %arg5[%c0_38, %c0_39], %61 {strides = array<i32>} : memref<8x128xf32, #tpu.memory_space<vmem>>, vector<8x128xf32>,
    return
  }
  func.func @transform_0(%arg0: i32, %arg1: i32) -> (i32, i32, i32, i32) {
    %c0_i32 = arith.constant 0 : i32
    %c0_i32_0 = arith.constant 0 : i32
    %c0_i32_1 = arith.constant 0 : i32
    %c0_i32_2 = arith.constant 0 : i32
    return %arg0, %c0_i32, %c0_i32_0, %c0_i32_1 : i32, i32, i32, i32
  }
  func.func @transform_1(%arg0: i32, %arg1: i32) -> (i32, i32, i32) {
    %c0_i32 = arith.constant 0 : i32
    %c0_i32_0 = arith.constant 0 : i32
    %c0_i32_1 = arith.constant 0 : i32
    %c0_i32_2 = arith.constant 0 : i32
    return %c0_i32, %c0_i32_0, %c0_i32_1 : i32, i32, i32
  }
  func.func @transform_2(%arg0: i32, %arg1: i32) -> (i32, i32, i32, i32) {
    %c0_i32 = arith.constant 0 : i32
    %c0_i32_0 = arith.constant 0 : i32
    %c0_i32_1 = arith.constant 0 : i32
    return %arg0, %arg1, %c0_i32, %c0_i32_0 : i32, i32, i32, i32
  }
  func.func @transform_3(%arg0: i32, %arg1: i32) -> (i32, i32) {
    %c2_i32 = arith.constant 2 : i32
    %0 = arith.muli %arg0, %c2_i32 : i32
    %1 = arith.addi %0, %arg1 : i32
    %c0_i32 = arith.constant 0 : i32
    %c0_i32_0 = arith.constant 0 : i32
    return %1, %c0_i32 : i32, i32
  }
}

module attributes {stable_mosaic.version = 11 : i64} {
  func.func @conv_stats_kernel(%arg0: i32, %arg1: i32, %arg2: memref<1x17x17x16xbf16, #tpu.memory_space<vmem>>, %arg3: memref<4x16x128xbf16, #tpu.memory_space<vmem>>, %arg4: memref<1x8x16x128xf32, #tpu.memory_space<vmem>>, %arg5: memref<8x128xf32, #tpu.memory_space<vmem>>) attributes {dimension_semantics = [#tpu.dimension_semantics<parallel>, #tpu.dimension_semantics<parallel>], iteration_bounds = array<i64: 2, 2>, scalar_prefetch = 0 : i64, scratch_operands = 0 : i64, tpu.core_type = #tpu.core_type<tc>, window_params = [{transform_indices = @transform_0, window_bounds = array<i64: 1, 17, 17, 16>}, {pipeline_mode = #tpu.pipeline_mode<synchronous>, transform_indices = @transform_1, window_bounds = array<i64: 4, 16, 128>}, {transform_indices = @transform_2, window_bounds = array<i64: 1, 8, 16, 128>}, {transform_indices = @transform_3, window_bounds = array<i64: 8, 128>}]} {
    %c8_i32 = arith.constant 8 : i32
    %0 = arith.muli %arg1, %c8_i32 : i32
    %c0_i32 = arith.constant 0 : i32
    %1 = arith.addi %0, %c0_i32 : i32
    %c0 = arith.constant 0 : index
    %2 = arith.index_cast %1 : i32 to index
    %c0_0 = arith.constant 0 : index
    %c0_1 = arith.constant 0 : index
    %3 = vector.load %arg2[%c0, %2, %c0_0, %c0_1] : memref<1x17x17x16xbf16, #tpu.memory_space<vmem>>, vector<1x8x16x16xbf16>
    %4 = vector.shape_cast %3 : vector<1x8x16x16xbf16> to vector<8x16x16xbf16>
    %5 = vector.shape_cast %4 : vector<8x16x16xbf16> to vector<128x16xbf16>
    %c0_2 = arith.constant 0 : index
    %c0_3 = arith.constant 0 : index
    %c0_4 = arith.constant 0 : index
    %6 = vector.load %arg3[%c0_2, %c0_3, %c0_4] : memref<4x16x128xbf16, #tpu.memory_space<vmem>>, vector<1x16x128xbf16>
    %7 = vector.shape_cast %6 : vector<1x16x128xbf16> to vector<16x128xbf16>
    %cst = arith.constant dense<0.000000e+00> : vector<128x128xf32>
    %8 = tpu.matmul %5, %7, %cst {dimension_numbers = #tpu.dot_dimension_numbers<[1], [0], [0], [1], [0, 0, 1, 1], [], []>} : vector<128x16xbf16>, vector<16x128xbf16>, vector<128x128xf32> -> vector<128x128xf32>
    %c8_i32_5 = arith.constant 8 : i32
    %9 = arith.muli %arg1, %c8_i32_5 : i32
    %c0_i32_6 = arith.constant 0 : i32
    %10 = arith.addi %9, %c0_i32_6 : i32
    %c0_7 = arith.constant 0 : index
    %11 = arith.index_cast %10 : i32 to index
    %c1 = arith.constant 1 : index
    %c0_8 = arith.constant 0 : index
    %12 = vector.load %arg2[%c0_7, %11, %c1, %c0_8] : memref<1x17x17x16xbf16, #tpu.memory_space<vmem>>, vector<1x8x16x16xbf16>
    %13 = vector.shape_cast %12 : vector<1x8x16x16xbf16> to vector<8x16x16xbf16>
    %14 = vector.shape_cast %13 : vector<8x16x16xbf16> to vector<128x16xbf16>
    %c1_9 = arith.constant 1 : index
    %c0_10 = arith.constant 0 : index
    %c0_11 = arith.constant 0 : index
    %15 = vector.load %arg3[%c1_9, %c0_10, %c0_11] : memref<4x16x128xbf16, #tpu.memory_space<vmem>>, vector<1x16x128xbf16>
    %16 = vector.shape_cast %15 : vector<1x16x128xbf16> to vector<16x128xbf16>
    %cst_12 = arith.constant dense<0.000000e+00> : vector<128x128xf32>
    %17 = tpu.matmul %14, %16, %cst_12 {dimension_numbers = #tpu.dot_dimension_numbers<[1], [0], [0], [1], [0, 0, 1, 1], [], []>} : vector<128x16xbf16>, vector<16x128xbf16>, vector<128x128xf32> -> vector<128x128xf32>
    %18 = arith.addf %8, %17 : vector<128x128xf32>
    %c8_i32_13 = arith.constant 8 : i32
    %19 = arith.muli %arg1, %c8_i32_13 : i32
    %c1_i32 = arith.constant 1 : i32
    %20 = arith.addi %19, %c1_i32 : i32
    %c0_14 = arith.constant 0 : index
    %21 = arith.index_cast %20 : i32 to index
    %c0_15 = arith.constant 0 : index
    %c0_16 = arith.constant 0 : index
    %22 = vector.load %arg2[%c0_14, %21, %c0_15, %c0_16] : memref<1x17x17x16xbf16, #tpu.memory_space<vmem>>, vector<1x8x16x16xbf16>
    %23 = vector.shape_cast %22 : vector<1x8x16x16xbf16> to vector<8x16x16xbf16>
    %24 = vector.shape_cast %23 : vector<8x16x16xbf16> to vector<128x16xbf16>
    %c2 = arith.constant 2 : index
    %c0_17 = arith.constant 0 : index
    %c0_18 = arith.constant 0 : index
    %25 = vector.load %arg3[%c2, %c0_17, %c0_18] : memref<4x16x128xbf16, #tpu.memory_space<vmem>>, vector<1x16x128xbf16>
    %26 = vector.shape_cast %25 : vector<1x16x128xbf16> to vector<16x128xbf16>
    %cst_19 = arith.constant dense<0.000000e+00> : vector<128x128xf32>
    %27 = tpu.matmul %24, %26, %cst_19 {dimension_numbers = #tpu.dot_dimension_numbers<[1], [0], [0], [1], [0, 0, 1, 1], [], []>} : vector<128x16xbf16>, vector<16x128xbf16>, vector<128x128xf32> -> vector<128x128xf32>
    %28 = arith.addf %18, %27 : vector<128x128xf32>
    %c8_i32_20 = arith.constant 8 : i32
    %29 = arith.muli %arg1, %c8_i32_20 : i32
    %c1_i32_21 = arith.constant 1 : i32
    %30 = arith.addi %29, %c1_i32_21 : i32
    %c0_22 = arith.constant 0 : index
    %31 = arith.index_cast %30 : i32 to index
    %c1_23 = arith.constant 1 : index
    %c0_24 = arith.constant 0 : index
    %32 = vector.load %arg2[%c0_22, %31, %c1_23, %c0_24] : memref<1x17x17x16xbf16, #tpu.memory_space<vmem>>, vector<1x8x16x16xbf16>
    %33 = vector.shape_cast %32 : vector<1x8x16x16xbf16> to vector<8x16x16xbf16>
    %34 = vector.shape_cast %33 : vector<8x16x16xbf16> to vector<128x16xbf16>
    %c3 = arith.constant 3 : index
    %c0_25 = arith.constant 0 : index
    %c0_26 = arith.constant 0 : index
    %35 = vector.load %arg3[%c3, %c0_25, %c0_26] : memref<4x16x128xbf16, #tpu.memory_space<vmem>>, vector<1x16x128xbf16>
    %36 = vector.shape_cast %35 : vector<1x16x128xbf16> to vector<16x128xbf16>
    %cst_27 = arith.constant dense<0.000000e+00> : vector<128x128xf32>
    %37 = tpu.matmul %34, %36, %cst_27 {dimension_numbers = #tpu.dot_dimension_numbers<[1], [0], [0], [1], [0, 0, 1, 1], [], []>} : vector<128x16xbf16>, vector<16x128xbf16>, vector<128x128xf32> -> vector<128x128xf32>
    %38 = arith.addf %28, %37 : vector<128x128xf32>
    %39 = vector.shape_cast %38 : vector<128x128xf32> to vector<1x8x16x128xf32>
    %c0_28 = arith.constant 0 : index
    %c0_29 = arith.constant 0 : index
    %c0_30 = arith.constant 0 : index
    %c0_31 = arith.constant 0 : index
    %40 = vector.load %arg4[%c0_28, %c0_29, %c0_30, %c0_31] : memref<1x8x16x128xf32, #tpu.memory_space<vmem>>, vector<1x8x16x128xf32>
    tpu.vector_store %arg4[%c0_28, %c0_29, %c0_30, %c0_31], %39 {strides = array<i32>} : memref<1x8x16x128xf32, #tpu.memory_space<vmem>>, vector<1x8x16x128xf32>,
    %cst_32 = arith.constant dense<0.000000e+00> : vector<128xf32>
    %41 = vector.multi_reduction <add>, %38, %cst_32 [0] : vector<128x128xf32> to vector<128xf32>
    %42 = vector.shape_cast %41 : vector<128xf32> to vector<1x128xf32>
    %cst_33 = arith.constant 7.812500e-03 : f32
    %43 = vector.broadcast %cst_33 : f32 to vector<1x128xf32>
    %44 = arith.mulf %42, %43 : vector<1x128xf32>
    %45 = vector.broadcast %44 : vector<1x128xf32> to vector<128x128xf32>
    %46 = arith.subf %38, %45 : vector<128x128xf32>
    %47 = arith.mulf %46, %46 : vector<128x128xf32>
    %cst_34 = arith.constant dense<0.000000e+00> : vector<128xf32>
    %48 = vector.multi_reduction <add>, %47, %cst_34 [0] : vector<128x128xf32> to vector<128xf32>
    %49 = vector.shape_cast %48 : vector<128xf32> to vector<1x128xf32>
    %50 = tpu.iota {dimensions = array<i32: 0>} : vector<8x128xi32>
    %c0_i32_35 = arith.constant 0 : i32
    %51 = vector.broadcast %c0_i32_35 : i32 to vector<8x128xi32>
    %52 = arith.cmpi eq, %50, %51 : vector<8x128xi32>
    %53 = vector.shape_cast %42 : vector<1x128xf32> to vector<1x128xf32>
    %54 = vector.broadcast %53 : vector<1x128xf32> to vector<8x128xf32>
    %c1_i32_36 = arith.constant 1 : i32
    %55 = vector.broadcast %c1_i32_36 : i32 to vector<8x128xi32>
    %56 = arith.cmpi eq, %50, %55 : vector<8x128xi32>
    %57 = vector.shape_cast %49 : vector<1x128xf32> to vector<1x128xf32>
    %58 = vector.broadcast %57 : vector<1x128xf32> to vector<8x128xf32>
    %cst_37 = arith.constant 0.000000e+00 : f32
    %59 = vector.broadcast %cst_37 : f32 to vector<8x128xf32>
    %60 = arith.select %56, %58, %59 : vector<8x128xi1>, vector<8x128xf32>
    %61 = arith.select %52, %54, %60 : vector<8x128xi1>, vector<8x128xf32>
    %c0_38 = arith.constant 0 : index
    %c0_39 = arith.constant 0 : index
    %62 = vector.load %arg5[%c0_38, %c0_39] : memref<8x128xf32, #tpu.memory_space<vmem>>, vector<8x128xf32>
    tpu.vector_store %arg5[%c0_38, %c0_39], %61 {strides = array<i32>} : memref<8x128xf32, #tpu.memory_space<vmem>>, vector<8x128xf32>,
    return
  }
  func.func @transform_0(%arg0: i32, %arg1: i32) -> (i32, i32, i32, i32) {
    %c0_i32 = arith.constant 0 : i32
    %c0_i32_0 = arith.constant 0 : i32
    %c0_i32_1 = arith.constant 0 : i32
    %c0_i32_2 = arith.constant 0 : i32
    return %arg0, %c0_i32, %c0_i32_0, %c0_i32_1 : i32, i32, i32, i32
  }
  func.func @transform_1(%arg0: i32, %arg1: i32) -> (i32, i32, i32) {
    %c0_i32 = arith.constant 0 : i32
    %c0_i32_0 = arith.constant 0 : i32
    %c0_i32_1 = arith.constant 0 : i32
    %c0_i32_2 = arith.constant 0 : i32
    return %c0_i32, %c0_i32_0, %c0_i32_1 : i32, i32, i32
  }
  func.func @transform_2(%arg0: i32, %arg1: i32) -> (i32, i32, i32, i32) {
    %c0_i32 = arith.constant 0 : i32
    %c0_i32_0 = arith.constant 0 : i32
    %c0_i32_1 = arith.constant 0 : i32
    return %arg0, %arg1, %c0_i32, %c0_i32_0 : i32, i32, i32, i32
  }
  func.func @transform_3(%arg0: i32, %arg1: i32) -> (i32, i32) {
    %c2_i32 = arith.constant 2 : i32
    %0 = arith.muli %arg0, %c2_i32 : i32
    %1 = arith.addi %0, %arg1 : i32
    %c0_i32 = arith.constant 0 : i32
    %c0_i32_0 = arith.constant 0 : i32
    return %1, %c0_i32 : i32, i32
  }
}

</mosaic_0001>

<bundles_post_ra>
// kernel: tpu_custom_call.1
= control target key start
LH: loop header
LB: loop body
LE: loop exit
PB: predicated region body
PF: predicated region fallthrough
CT: control target
= control target key end

     0   :  { %s2373_s0 = inlined_call_operand.vmem [shape: bf16[2,17,17,16], index: 0, kind: input, shape index: {}]   ;;  %s2374_s1 = inlined_call_operand.vmem [shape: bf16[4,16,128], index: 1, kind: input, shape index: {}]   ;;  %s2375_s2 = inlined_call_operand.hbm [shape: f32[2,16,16,128], index: 2, kind: output, shape index: {0}]   ;;  %s2376_s3 = inlined_call_operand.hbm [shape: f32[32,128], index: 3, kind: output, shape index: {1}]  }
   0x1   :  { %2380 = sst [smem:[#allocation10_spill]] %s2373_s0 }
   0x2   :  { %2381 = sst [smem:[#allocation11_spill]] %s2376_s3 }
   0x3   :  { %9 = vsyncpa [#allocation3], 0 }
   0x4   :  { %11 = vsyncpa [#allocation3 + $0x1], 0 }
   0x5   :  { %12 = vsyncpa [#allocation5], 0 }
   0x6   :  { %14 = vsyncpa [#allocation5 + $0x1], 0  ;;  %s1886_s12 = smov 0   ;;  %s1888_s13 = smov 0  }
   0x7   :  { %s1890_s14 = smov 0   ;;  %s1892_s15 = smov 0  }
   0x8   :  { %s1894_s16 = smov 0   ;;  %s1896_s17 = smov 0  }
   0x9   :  { %s1898_s18 = smov 0   ;;  %s1900_s19 = smov 0  }
   0xa   :  { %s1902_s20 = smov 0   ;;  %s1904_s21 = smov 0  }
   0xb   :  { %s1906_s22 = smov 0  }
   0xc LB: > { %2382 = sst [smem:[#allocation8_spill]] %s1834_s15  ;;  %s1404_s23 = sadd.s32 4294967295, %s1862_s22   ;;  %s1862_s22 = sphi %s1906_s22, %s20_s22   ;;  %s1858_s21 = sphi %s1904_s21, %s2406_s21   ;;  %s1854_s20 = sphi %s1902_s20, %s2405_s20   ;;  %s1850_s19 = sphi %s1900_s19, %s2404_s19   ;;  %s1846_s18 = sphi %s1898_s18, %s2403_s18   ;;  %s1842_s17 = sphi %s1896_s17, %s2402_s17   ;;  %s1838_s16 = sphi %s1894_s16, %s2401_s16   ;;  %s1834_s15 = sphi %s1892_s15, %s2400_s15   ;;  %s1830_s14 = sphi %s1890_s14, %s2399_s14   ;;  %s1826_s13 = sphi %s1888_s13, %s2398_s13   ;;  %s1822_s12 = sphi %s1886_s12, %s2397_s12  }
   0xd   : > { %s1405_s24 = sadd.s32 4294967294, %s1862_s22   ;;  %s29_s25 = sadd.s32 1, %s1854_s20 }
   0xe   : > { %s32_s26 = sadd.s32 1, %s1858_s21  ;;  %p30_p0 = scmp.ge.s32.totalorder %s29_s25, 2 }
   0xf   : > { %s88_s27 = sadd.s32 1, %s1842_s17  ;;  %p98_p1 = scmp.ne.s32.totalorder %s1842_s17, %s1838_s16 }
  0x10   : > { %p1948_p2 = scmp.eq.s32.totalorder %s1404_s23, 3  ;;  %s2408_s25 = smov (%p30_p0, %s29_s25), 0 }
  0x11   : > { %s2410_s26 = smov (!%p30_p0, %s32_s26), %s1858_s21  ;;  %s84_s29 = ssub.s32 %s1854_s20, %s2408_s25 }
  0x12   : > { %p1959_p3 = por %p1948_p2, %p98_p1  ;;  %p34_p4 = scmp.ge.s32.totalorder %s2410_s26, 2 }
  0x13   : > { %p104_p5 = scmp.ne.s32.totalorder %s1838_s16, %s1834_s15  ;;  %p1965_p6 = scmp.eq.s32.totalorder %s1405_s24, 3 }
  0x14   : > { %s1406_s5 = sshll.u32 %s1858_s21, 1  ;;  %s2412_s26 = smov (%p34_p4, %s2410_s26), 0 }
  0x15   : > { %2386 = sst [smem:[#allocation9_spill]] %s2412_s26  ;;  %p1974_p7 = por %p1965_p6, %p104_p5 }
  0x16   : > { %s112_s7 = sadd.s32 %s1854_s20, %s1406_s5  ;;  %s83_s8 = ssub.s32 %s1858_s21, %s2412_s26 }
  0x17   : > { %s1407_s9 = sshll.u32 %s2412_s26, 1  ;;  %s85_s10 = sor.u32 %s84_s29, %s83_s8 }
  0x18   : > { %s114_s11 = sadd.s32 %s1407_s9, %s2408_s25  ;;  %p86_p8 = scmp.eq.s32.totalorder %s85_s10, 0 }
  0x19   : > { %s115_s23 = ssub.s32 %s112_s7, %s114_s11  ;;  %s118_s24 = sadd.s32 1, %s1830_s14 }
  0x1a   : > { %p116_p9 = scmp.eq.s32.totalorder %s115_s23, 0  ;;  %p128_p10 = scmp.ne.s32.totalorder %s1830_s14, %s1826_s13 }
  0x1b   : > { %s1985_s15 = scalar_select %p86_p8, %s1842_s17, %s88_s27  }
  0x1c   : > { %s1988_s3 = scalar_select %p116_p9, %s1830_s14, %s118_s24  }
  0x1d   : > { %p134_p11 = scmp.ne.s32.totalorder %s1826_s13, %s1822_s12  ;;  %p1410_p12 = scmp.ge.s32.totalorder %s1862_s22, 1 }
  0x1e   : > { %p164_p13 = scmp.lt.s32.totalorder %s1862_s22, 5  ;;  %p1998_p0 = por %p128_p10, %p1948_p2 }
  0x1f   : > { %p2004_p1 = por %p134_p11, %p1965_p6 }
  0x20   : > { %p165_p4 = pnand %p1410_p12, %p164_p13 }
  0x21   : > { %p193_p5 = scmp.lt.s32.totalorder (!%p165_p4), %s1850_s19, 1  ;;  %s1587_s24 = smul.u32 (!%p165_p4), 96, %s1846_s18 }
  0x22   : > { %168 = sbr.rel (%p165_p4) target bundleno = 384 (0x180), region = 28  ;;  %s2390_s0 = sld [smem:[#allocation10_spill]] (!%p165_p4) }
  0x23   : > { %s183_s26 = sand.u32 (!%p165_p4), 1, %s1838_s16   ;;  %s1608_s10 = sshll.u32 (!%p165_p4), %s1846_s18, 4 }
  0x24   : > { %s1411_s9 = sshll.u32 (!%p165_p4), %s183_s26, 7  ;;  %s1581_s11 = sshll.u32 (!%p165_p4), %s1850_s19, 5 }
  0x25   : > { %s2199_s4 = scalar_lea.vmem (!%p165_p4), [#allocation2], %s1411_s9  ;;  %s1732_s7 = scalar_lea.hbm (!%p165_p4), %s2375_s2, 512 }
  0x27   : > { %v1606_v0 = vld [vmem:[%s2374_s1 + $0x10] sm:$0xff]  ;;  %v1596_v1 = vld [vmem:[%s2374_s1] sm:$0xff]  ;;  %v1597_v2 = vld [vmem:[%s2374_s1 + $0x8] sm:$0xff]  ;;  %s194_s23 = scalar_select %p193_p5, %s1850_s19, 1  ;;  %vm460_vm0 = vcmask 130048  }
  0x28   : > { %v1607_v3 = vld [vmem:[%s2374_s1 + $0x18] sm:$0xff]  ;;  %753 = vmatpush.bf16.msra.mxu2 %v1606_v0  ;;  %611 = vmatpush.bf16.msra.mxu1 %v1596_v1  ;;  %vm232_vm1 = vsmask.f32 3328  ;;  %vm233_vm2 = vsmask.f32 7440 }
  0x29   : > { %492 = vmatpush.bf16.msra.mxu0 %v1597_v2  ;;  %1091 = vmatpush.bf16.msra.mxu3 %v1607_v3  ;;  %s1609_s27 = smul.u32 204, %s194_s23  ;;  %vm2041_vm3 = vmor %vm232_vm1, %vm233_vm2  ;;  %s1265_s23 = sadd.s32 %s1608_s10, %s1581_s11 }
  0x2a   : > { %s1248_s10 = scalar_lea.sflag [#allocation3], %s183_s26 }
  0x2b   : > { %s197_s28 = scalar_lea.vmem %s2390_s0, %s1609_s27 }
  0x2c   : > { %s2026_s8 = scalar_lea.vmem %s197_s28, %s1587_s24  ;;  %s1582_s24 = sshll.u32 %s1265_s23, 3 }
  0x2d   : > { %v1598_v4 = vld [vmem:[%s2026_s8 + $0xc] sm:$0xff]  ;;  %v1588_v5 = vld [vmem:[%s2026_s8] sm:$0xff]  ;;  %v224_v8 = vld [vmem:[%s2026_s8 + $0x8] sm:$0x1]  ;;  %s1267_s28 = scalar_lea.hbm %s2375_s2, %s1582_s24 }
  0x2e   : > { %v206_v6 = vld [vmem:[%s2026_s8] sm:$0xf]  ;;  %v207_v7 = vld [vmem:[%s2026_s8 + $0x4] sm:$0xf]  ;;  %1531 = vmatmul.msk.bf16.vlgmr.msra.gmra.mxu2 %vm460_vm0, %v1598_v4  ;;  %1467 = vmatmul.msk.bf16.vlgmr.msra.gmra.mxu1 %vm460_vm0, %v1588_v5  ;;  %v255_v13 = vshll.u32 %v224_v8, 16  ;;  %v1599_v2 = vld [vmem:[%s2026_s8 + $0x18] sm:$0xff] }
  0x2f   : > { %v236_v9 = vshrl.u32 %v206_v6, 16  ;;  %v239_v10 = vshll.u32 %v206_v6, 16  ;;  %v245_v11 = vshll.u32 %v207_v7, 16  ;;  %v249_v12 = vshrl.u32 %v207_v7, 16  ;;  %v1539_v14 = vld [vmem:[%s2026_s8 + $0xc] sm:$0xf] }
  0x30   : > { %v1540_v17 = vld [vmem:[%s2026_s8 + $0x10] sm:$0xf]  ;;  %v1541_v18 = vld [vmem:[%s2026_s8 + $0x14] sm:$0x1]  ;;  %v836_v21 = vshrl.u32 %v1539_v14, 16  ;;  %v839_v23 = vshll.u32 %v1539_v14, 16 }
  0x31   : > { %v238_v15 = vrot.slane %v236_v9, 4  ;;  %v241_v16 = vrot.slane %v239_v10, 5  ;;  %v247_v19 = vrot.slane %v245_v11, 5  ;;  %v251_v20 = vrot.slane %v249_v12, 4  ;;  %v208_v26 = vld [vmem:[%s2026_s8 + $0xc] sm:$0xf] }
  0x32   : > { %v845_v24 = vshll.u32 %v1540_v17, 16  ;;  %v849_v25 = vshrl.u32 %v1540_v17, 16  ;;  %v257_v29 = vrot.slane %v255_v13, 5  ;;  %v838_v30 = vrot.slane %v836_v21, 4  ;;  %v209_v32 = vld [vmem:[%s2026_s8 + $0x10] sm:$0xf] }
  0x33   : > { %v242_v22 = vor.u32 %v241_v16, %v238_v15  ;;  %v252_v28 = vor.u32 %v251_v20, %v247_v19  ;;  %v855_v31 = vshll.u32 %v1541_v18, 16  ;;  %v841_v34 = vrot.slane %v839_v23, 5  ;;  %v225_v44 = vld [vmem:[%s2026_s8 + $0x14] sm:$0x1]  ;;  %v1542_v46 = vld [vmem:[%s2026_s8 + $0x18] sm:$0xf] }
  0x34   : > { %v847_v35 = vrot.slane %v845_v24, 5  ;;  %v851_v36 = vrot.slane %v849_v25, 4  ;;  %v260_v39 = vshrl.u32 %v208_v26, 16  ;;  %v263_v40 = vshll.u32 %v208_v26, 16  ;;  %v1543_v58 = vld [vmem:[%s2026_s8 + $0x1c] sm:$0xf] }
  0x35   : > { %v243_v33 = vrot.slane %v242_v22, 4  ;;  %v253_v37 = vrot.slane %v252_v28, 4  ;;  %v857_v38 = vrot.slane %v855_v31, 5  ;;  %v842_v42 = vor.u32 %v841_v34, %v838_v30  ;;  %v1589_v3 = vld [vmem:[%s2026_s8 + $0xc] sm:$0xff]  ;;  %v1544_v5 = vld [vmem:[%s2026_s8 + $0x20] sm:$0x1] }
  0x36   : > { %v852_v43 = vor.u32 %v851_v36, %v847_v35  ;;  %v269_v45 = vshll.u32 %v209_v32, 16  ;;  %v262_v49 = vrot.slane %v260_v39, 4  ;;  %v265_v50 = vrot.slane %v263_v40, 5  ;;  %v210_v10 = vld [vmem:[%s2026_s8 + $0x18] sm:$0xf]  ;;  %s1270_s9 = sshll.u32 %s1267_s28, 4  ;;  %s1271_s9 = int_to_ptr.hbm [resolvable:$true] %s1270_s9 }
  0x37   : > { %v248_v41 = vsel %vm2041_vm3, %v243_v33, %v247_v19  ;;  %v258_v47 = vsel %vm2041_vm3, %v253_v37, %v257_v29  ;;  %v843_v52 = vrot.slane %v842_v42, 4  ;;  %v273_v56 = vshrl.u32 %v209_v32, 16  ;;  %v211_v15 = vld [vmem:[%s2026_s8 + $0x1c] sm:$0xf]  ;;  %v1545_v31 = vld [vmem:[%s2026_s8 + $0x24] sm:$0xf] }
  0x38   : > { %v430_v48 = vunpack.c.l.b16 %v248_v41  ;;  %v431_v51 = vunpack.c.l.b16 %v258_v47  ;;  %v853_v53 = vrot.slane %v852_v43, 4  ;;  %v271_v54 = vrot.slane %v269_v45, 5  ;;  %v1546_v34 = vld [vmem:[%s2026_s8 + $0x28] sm:$0xf]  ;;  %v226_v41 = vld [vmem:[%s2026_s8 + $0x20] sm:$0x1] }
  0x39   : > { %v266_v55 = vor.u32 %v265_v50, %v262_v49  ;;  %v279_v57 = vshll.u32 %v225_v44, 16  ;;  %v860_v59 = vshrl.u32 %v1542_v46, 16  ;;  %v848_v61 = vsel %vm2041_vm3, %v843_v52, %v847_v35  ;;  %s1726_s11 = sshra.s32 %s1271_s9, 4  ;;  %s1727_s11 = int_to_ptr.hbm [resolvable:$true] %s1726_s11 }
  0x3a   : > { %v446_v60 = vpack.c.b16 %v431_v51, %v430_v48  ;;  %v858_v62 = vsel %vm2041_vm3, %v853_v53, %v857_v38  ;;  %v863_v63 = vshll.u32 %v1542_v46, 16  ;;  %v1030_v0 = vunpack.c.l.b16 %v848_v61  ;;  %s1728_s23 = scalar_lea.hbm %s1727_s11, 128  ;;  %p1733_p9 = scmp.lt.s32.totalorder %s1727_s11, %s2375_s2 }
  0x3b   : > { %v1031_v1 = vunpack.c.l.b16 %v858_v62  ;;  %v275_v4 = vrot.slane %v273_v56, 4  ;;  %v267_v6 = vrot.slane %v266_v55, 4  ;;  %v862_v7 = vrot.slane %v860_v59, 4  ;;  %v1547_v56 = vld [vmem:[%s2026_s8 + $0x2c] sm:$0x1]  ;;  %p1729_p2 = scmp.ne.s32.totalorder %s1727_s11, %s1728_s23  ;;  %p1734_p10 = scmp.lt.s32.totalorder %s1732_s7, %s1728_s23 }
  0x3c   : > { %1423 = vmatmul.msk.bf16.vlgmr.msra.gmra.mxu0 %vm460_vm0, %v446_v60  ;;  %v865_v8 = vrot.slane %v863_v63, 5  ;;  %v869_v9 = vshll.u32 %v1543_v58, 16  ;;  %v281_v13 = vrot.slane %v279_v57, 5  ;;  %v873_v14 = vshrl.u32 %v1543_v58, 16  ;;  %v1600_v60 = vld [vmem:[%s2026_s8 + $0x24] sm:$0xff] }
  0x3d   : > { %v1046_v11 = vpack.c.b16 %v1031_v1, %v1030_v0  ;;  %v276_v12 = vor.u32 %v275_v4, %v271_v54  ;;  %v879_v18 = vshll.u32 %v1544_v5, 16  ;;  %v284_v21 = vshrl.u32 %v210_v10, 16  ;;  %v212_v0 = vld [vmem:[%s2026_s8 + $0x24] sm:$0xf]  ;;  %v1590_v1 = vld [vmem:[%s2026_s8 + $0x18] sm:$0xff]  ;;  %p1730_p6 = pnand %p1729_p2, %p1959_p3  ;;  %p1735_p11 = por %p1734_p10, %p1733_p9 }
  0x3e   : > { %v866_v16 = vor.u32 %v865_v8, %v862_v7  ;;  %v871_v17 = vrot.slane %v869_v9, 5  ;;  %1532 = vmatmul.msk.bf16.gmra.mxu2 %vm460_vm0, %v1599_v2  ;;  %v875_v20 = vrot.slane %v873_v14, 4  ;;  %v287_v22 = vshll.u32 %v210_v10, 16  ;;  %1468 = vmatmul.msk.bf16.gmra.mxu1 %vm460_vm0, %v1589_v3  ;;  %v213_v4 = vld [vmem:[%s2026_s8 + $0x28] sm:$0xf] }
  0x3f   : > { %1569 = vmatmul.msk.bf16.vlgmr.msra.gmra.mxu3 %vm460_vm0, %v1046_v11  ;;  %v277_v19 = vrot.slane %v276_v12, 4  ;;  %v293_v24 = vshll.u32 %v211_v15, 16  ;;  %v297_v25 = vshrl.u32 %v211_v15, 16  ;;  %v272_v26 = vsel %vm2041_vm3, %v267_v6, %v271_v54  ;;  %v1548_v14 = vld [vmem:[%s2026_s8 + $0x30] sm:$0xf]  ;;  %p1731_p8 = pneg %p1730_p6 }
  0x40   : > { %v867_v23 = vrot.slane %v866_v16, 4  ;;  %v876_v29 = vor.u32 %v875_v20, %v871_v17  ;;  %v881_v30 = vrot.slane %v879_v18, 5  ;;  %v286_v32 = vrot.slane %v284_v21, 4  ;;  %v1549_v15 = vld [vmem:[%s2026_s8 + $0x34] sm:$0xf] }
  0x41   : > { %v282_v28 = vsel %vm2041_vm3, %v277_v19, %v281_v13  ;;  %v289_v33 = vrot.slane %v287_v22, 5  ;;  %v295_v37 = vrot.slane %v293_v24, 5  ;;  %v299_v38 = vrot.slane %v297_v25, 4  ;;  %v227_v20 = vld [vmem:[%s2026_s8 + $0x2c] sm:$0x1]  ;;  %p1736_p12 = pnand %p1735_p11, %p1731_p8 }
  0x42   : > { %v872_v35 = vsel %vm2041_vm3, %v867_v23, %v871_v17  ;;  %v877_v36 = vrot.slane %v876_v29, 4  ;;  %v432_v39 = vunpack.c.l.b16 %v272_v26  ;;  %v433_v40 = vunpack.c.l.b16 %v282_v28 }
  0x43   : > { %v884_v42 = vshrl.u32 %v1545_v31, 16  ;;  %v887_v43 = vshll.u32 %v1545_v31, 16  ;;  %v893_v45 = vshll.u32 %v1546_v34, 16  ;;  %v1032_v46 = vunpack.c.l.b16 %v872_v35 }
  0x44   : > { %v882_v44 = vsel %vm2041_vm3, %v877_v36, %v881_v30  ;;  %v290_v47 = vor.u32 %v289_v33, %v286_v32  ;;  %v300_v51 = vor.u32 %v299_v38, %v295_v37  ;;  %v303_v52 = vshll.u32 %v226_v41, 16  ;;  %v1550_v38 = vld [vmem:[%s2026_s8 + $0x38] sm:$0x1] }
  0x45   : > { %v886_v48 = vrot.slane %v884_v42, 4  ;;  %v889_v49 = vrot.slane %v887_v43, 5  ;;  %v1033_v50 = vunpack.c.l.b16 %v882_v44  ;;  %v897_v53 = vshrl.u32 %v1546_v34, 16  ;;  %v1601_v42 = vld [vmem:[%s2026_s8 + $0x30] sm:$0xff] }
  0x46   : > { %v447_v54 = vpack.c.b16 %v433_v40, %v432_v39  ;;  %v895_v55 = vrot.slane %v893_v45, 5  ;;  %v291_v61 = vrot.slane %v290_v47, 4  ;;  %v301_v62 = vrot.slane %v300_v51, 4  ;;  %v1591_v45 = vld [vmem:[%s2026_s8 + $0x24] sm:$0xff]  ;;  %v215_v51 = vld [vmem:[%s2026_s8 + $0x34] sm:$0xf] }
  0x47   : > { %v899_v57 = vrot.slane %v897_v53, 4  ;;  %v890_v58 = vor.u32 %v889_v49, %v886_v48  ;;  %v1047_v59 = vpack.c.b16 %v1033_v50, %v1032_v46  ;;  %v305_v63 = vrot.slane %v303_v52, 5  ;;  %v214_v50 = vld [vmem:[%s2026_s8 + $0x30] sm:$0xf]  ;;  %v1551_v52 = vld [vmem:[%s2026_s8 + $0x3c] sm:$0xf] }
  0x48   : > { %v903_v3 = vshll.u32 %v1547_v56, 16  ;;  %v308_v6 = vshrl.u32 %v212_v0, 16  ;;  %v296_v7 = vsel %vm2041_vm3, %v291_v61, %v295_v37  ;;  %v311_v9 = vshll.u32 %v212_v0, 16 }
  0x49   : > { %v900_v2 = vor.u32 %v899_v57, %v895_v55  ;;  %v891_v5 = vrot.slane %v890_v58, 4  ;;  %v306_v8 = vsel %vm2041_vm3, %v301_v62, %v305_v63  ;;  %v317_v10 = vshll.u32 %v213_v4, 16  ;;  %v1552_v62 = vld [vmem:[%s2026_s8 + $0x40] sm:$0xf] }
  0x4a   : > { %v905_v12 = vrot.slane %v903_v3, 5  ;;  %v321_v13 = vshrl.u32 %v213_v4, 16  ;;  %v434_v16 = vunpack.c.l.b16 %v296_v7  ;;  %v435_v17 = vunpack.c.l.b16 %v306_v8 }
  0x4b   : > { %v901_v11 = vrot.slane %v900_v2, 4  ;;  %v896_v18 = vsel %vm2041_vm3, %v891_v5, %v895_v55  ;;  %v310_v19 = vrot.slane %v308_v6, 4  ;;  %v313_v21 = vrot.slane %v311_v9, 5 }
  0x4c   : > { %1424 = vmatmul.msk.bf16.gmra.mxu0 %vm460_vm0, %v447_v54  ;;  %v319_v22 = vrot.slane %v317_v10, 5  ;;  %v908_v23 = vshrl.u32 %v1548_v14, 16  ;;  %v911_v24 = vshll.u32 %v1548_v14, 16  ;;  %v323_v26 = vrot.slane %v321_v13, 4  ;;  %v228_v13 = vld [vmem:[%s2026_s8 + $0x38] sm:$0x1] }
  0x4d   : > { %v906_v25 = vsel %vm2041_vm3, %v901_v11, %v905_v12  ;;  %v917_v28 = vshll.u32 %v1549_v15, 16  ;;  %v921_v29 = vshrl.u32 %v1549_v15, 16  ;;  %v448_v30 = vpack.c.b16 %v435_v17, %v434_v16 }
  0x4e   : > { %1533 = vmatmul.msk.bf16.gmra.mxu2 %vm460_vm0, %v1600_v60  ;;  %1469 = vmatmul.msk.bf16.gmra.mxu1 %vm460_vm0, %v1590_v1  ;;  %v327_v31 = vshll.u32 %v227_v20, 16  ;;  %v1034_v32 = vunpack.c.l.b16 %v896_v18  ;;  %v1035_v33 = vunpack.c.l.b16 %v906_v25  ;;  %v910_v34 = vrot.slane %v908_v23, 4  ;;  %v1602_v25 = vld [vmem:[%s2026_s8 + $0x3c] sm:$0xff] }
  0x4f   : > { %1570 = vmatmul.msk.bf16.gmra.mxu3 %vm460_vm0, %v1047_v59  ;;  %v913_v35 = vrot.slane %v911_v24, 5  ;;  %v314_v36 = vor.u32 %v313_v21, %v310_v19  ;;  %v324_v37 = vor.u32 %v323_v26, %v319_v22  ;;  %v919_v39 = vrot.slane %v917_v28, 5  ;;  %v216_v26 = vld [vmem:[%s2026_s8 + $0x3c] sm:$0xf]  ;;  %v1592_v28 = vld [vmem:[%s2026_s8 + $0x30] sm:$0xff] }
  0x50   : > { %v923_v40 = vrot.slane %v921_v29, 4  ;;  %v1048_v41 = vpack.c.b16 %v1035_v33, %v1034_v32  ;;  %v927_v44 = vshll.u32 %v1550_v38, 16  ;;  %v329_v48 = vrot.slane %v327_v31, 5  ;;  %v217_v31 = vld [vmem:[%s2026_s8 + $0x40] sm:$0xf] }
  0x51   : > { %v914_v43 = vor.u32 %v913_v35, %v910_v34  ;;  %v315_v46 = vrot.slane %v314_v36, 4  ;;  %v325_v47 = vrot.slane %v324_v37, 4  ;;  %v332_v55 = vshrl.u32 %v214_v50, 16 }
  0x52   : > { %v924_v49 = vor.u32 %v923_v40, %v919_v39  ;;  %v929_v54 = vrot.slane %v927_v44, 5  ;;  %v335_v59 = vshll.u32 %v214_v50, 16  ;;  %v341_v60 = vshll.u32 %v215_v51, 16  ;;  %v1554_v40 = vld [vmem:[%s2026_s8 + $0x48] sm:$0xf] }
  0x53   : > { %v915_v53 = vrot.slane %v914_v43, 4  ;;  %v320_v56 = vsel %vm2041_vm3, %v315_v46, %v319_v22  ;;  %v330_v57 = vsel %vm2041_vm3, %v325_v47, %v329_v48  ;;  %v345_v61 = vshrl.u32 %v215_v51, 16  ;;  %v1553_v22 = vld [vmem:[%s2026_s8 + $0x44] sm:$0x1] }
  0x54   : > { %v925_v58 = vrot.slane %v924_v49, 4  ;;  %v932_v63 = vshrl.u32 %v1551_v52, 16  ;;  %v935_v0 = vshll.u32 %v1551_v52, 16  ;;  %v436_v1 = vunpack.c.l.b16 %v320_v56 }
  0x55   : > { %v437_v2 = vunpack.c.l.b16 %v330_v57  ;;  %v920_v3 = vsel %vm2041_vm3, %v915_v53, %v919_v39  ;;  %v334_v4 = vrot.slane %v332_v55, 4  ;;  %v337_v6 = vrot.slane %v335_v59, 5 }
  0x56   : > { %v930_v5 = vsel %vm2041_vm3, %v925_v58, %v929_v54  ;;  %v941_v7 = vshll.u32 %v1552_v62, 16  ;;  %v945_v8 = vshrl.u32 %v1552_v62, 16  ;;  %v343_v9 = vrot.slane %v341_v60, 5  ;;  %v229_v58 = vld [vmem:[%s2026_s8 + $0x44] sm:$0x1] }
  0x57   : > { %v347_v10 = vrot.slane %v345_v61, 4  ;;  %v934_v11 = vrot.slane %v932_v63, 4  ;;  %v937_v12 = vrot.slane %v935_v0, 5  ;;  %v1036_v14 = vunpack.c.l.b16 %v920_v3 }
  0x58   : > { %v1037_v15 = vunpack.c.l.b16 %v930_v5  ;;  %v449_v16 = vpack.c.b16 %v437_v2, %v436_v1  ;;  %v943_v17 = vrot.slane %v941_v7, 5  ;;  %v947_v18 = vrot.slane %v945_v8, 4 }
  0x59   : > { %v338_v19 = vor.u32 %v337_v6, %v334_v4  ;;  %v348_v20 = vor.u32 %v347_v10, %v343_v9  ;;  %v351_v21 = vshll.u32 %v228_v13, 16  ;;  %v938_v23 = vor.u32 %v937_v12, %v934_v11  ;;  %v1556_v4 = vld [vmem:[%s2026_s8 + $0x50] sm:$0x1]  ;;  %v1603_v10 = vld [vmem:[%s2026_s8 + $0x48] sm:$0xff] }
  0x5a   : > { %v1049_v24 = vpack.c.b16 %v1037_v15, %v1036_v14  ;;  %v948_v29 = vor.u32 %v947_v18, %v943_v17  ;;  %v356_v36 = vshrl.u32 %v216_v26, 16  ;;  %v359_v37 = vshll.u32 %v216_v26, 16  ;;  %v1593_v14 = vld [vmem:[%s2026_s8 + $0x3c] sm:$0xff]  ;;  %v218_v15 = vld [vmem:[%s2026_s8 + $0x48] sm:$0xf] }
  0x5b   : > { %v339_v32 = vrot.slane %v338_v19, 4  ;;  %v349_v33 = vrot.slane %v348_v20, 4  ;;  %v353_v34 = vrot.slane %v351_v21, 5  ;;  %v939_v35 = vrot.slane %v938_v23, 4  ;;  %v1557_v26 = vld [vmem:[%s2026_s8 + $0x54] sm:$0xf] }
  0x5c   : > { %1425 = vmatmul.msk.bf16.gmra.mxu0 %vm460_vm0, %v448_v30  ;;  %v951_v30 = vshll.u32 %v1553_v22, 16  ;;  %v365_v38 = vshll.u32 %v217_v31, 16  ;;  %v369_v39 = vshrl.u32 %v217_v31, 16  ;;  %v956_v47 = vshrl.u32 %v1554_v40, 16 }
  0x5d   : > { %v344_v44 = vsel %vm2041_vm3, %v339_v32, %v343_v9  ;;  %v944_v46 = vsel %vm2041_vm3, %v939_v35, %v943_v17  ;;  %v959_v48 = vshll.u32 %v1554_v40, 16  ;;  %v358_v51 = vrot.slane %v356_v36, 4 }
  0x5e   : > { %1534 = vmatmul.msk.bf16.gmra.mxu2 %vm460_vm0, %v1601_v42  ;;  %1470 = vmatmul.msk.bf16.gmra.mxu1 %vm460_vm0, %v1591_v45  ;;  %v949_v42 = vrot.slane %v948_v29, 4  ;;  %v953_v43 = vrot.slane %v951_v30, 5  ;;  %v354_v45 = vsel %vm2041_vm3, %v349_v33, %v353_v34  ;;  %v361_v52 = vrot.slane %v359_v37, 5 }
  0x5f   : > { %1571 = vmatmul.msk.bf16.gmra.mxu3 %vm460_vm0, %v1048_v41  ;;  %v1555_v41 = vld [vmem:[%s2026_s8 + $0x4c] sm:$0xf]  ;;  %v367_v53 = vrot.slane %v365_v38, 5  ;;  %v371_v54 = vrot.slane %v369_v39, 4  ;;  %v438_v55 = vunpack.c.l.b16 %v344_v44  ;;  %v439_v56 = vunpack.c.l.b16 %v354_v45 }
  0x60   : > { %v965_v49 = vshll.u32 %v1555_v41, 16  ;;  %v969_v50 = vshrl.u32 %v1555_v41, 16  ;;  %v954_v57 = vsel %vm2041_vm3, %v949_v42, %v953_v43  ;;  %v1038_v59 = vunpack.c.l.b16 %v944_v46  ;;  %v230_v41 = vld [vmem:[%s2026_s8 + $0x50] sm:$0x1] }
  0x61   : > { %v958_v60 = vrot.slane %v956_v47, 4  ;;  %v961_v61 = vrot.slane %v959_v48, 5  ;;  %v1039_v0 = vunpack.c.l.b16 %v954_v57  ;;  %v362_v1 = vor.u32 %v361_v52, %v358_v51  ;;  %v1559_v52 = vld [vmem:[%s2026_s8 + $0x5c] sm:$0x1] }
  0x62   : > { %v967_v62 = vrot.slane %v965_v49, 5  ;;  %v971_v63 = vrot.slane %v969_v50, 4  ;;  %v372_v2 = vor.u32 %v371_v54, %v367_v53  ;;  %v375_v3 = vshll.u32 %v229_v58, 16  ;;  %v1604_v54 = vld [vmem:[%s2026_s8 + $0x54] sm:$0xff]  ;;  %v1594_v58 = vld [vmem:[%s2026_s8 + $0x48] sm:$0xff] }
  0x63   : > { %v450_v5 = vpack.c.b16 %v439_v56, %v438_v55  ;;  %v962_v6 = vor.u32 %v961_v61, %v958_v60  ;;  %v975_v8 = vshll.u32 %v1556_v4, 16  ;;  %v1050_v9 = vpack.c.b16 %v1039_v0, %v1038_v59 }
  0x64   : > { %v972_v7 = vor.u32 %v971_v63, %v967_v62  ;;  %v363_v11 = vrot.slane %v362_v1, 4  ;;  %v373_v12 = vrot.slane %v372_v2, 4  ;;  %v377_v13 = vrot.slane %v375_v3, 5  ;;  %v221_v63 = vld [vmem:[%s2026_s8 + $0x58] sm:$0xf] }
  0x65   : > { %v963_v17 = vrot.slane %v962_v6, 4  ;;  %v977_v19 = vrot.slane %v975_v8, 5  ;;  %v380_v22 = vshrl.u32 %v218_v15, 16  ;;  %v383_v23 = vshll.u32 %v218_v15, 16 }
  0x66   : > { %v973_v18 = vrot.slane %v972_v7, 4  ;;  %v368_v20 = vsel %vm2041_vm3, %v363_v11, %v367_v53  ;;  %v378_v21 = vsel %vm2041_vm3, %v373_v12, %v377_v13  ;;  %v980_v33 = vshrl.u32 %v1557_v26, 16 }
  0x67   : > { %v440_v29 = vunpack.c.l.b16 %v368_v20  ;;  %v441_v30 = vunpack.c.l.b16 %v378_v21  ;;  %v968_v31 = vsel %vm2041_vm3, %v963_v17, %v967_v62  ;;  %v983_v34 = vshll.u32 %v1557_v26, 16  ;;  %v220_v62 = vld [vmem:[%s2026_s8 + $0x54] sm:$0xf] }
  0x68   : > { %v978_v32 = vsel %vm2041_vm3, %v973_v18, %v977_v19  ;;  %v382_v37 = vrot.slane %v380_v22, 4  ;;  %v385_v38 = vrot.slane %v383_v23, 5  ;;  %v1040_v42 = vunpack.c.l.b16 %v968_v31  ;;  %v231_v23 = vld [vmem:[%s2026_s8 + $0x5c] sm:$0x1] }
  0x69   : > { %v1041_v43 = vunpack.c.l.b16 %v978_v32  ;;  %v982_v44 = vrot.slane %v980_v33, 4  ;;  %v985_v45 = vrot.slane %v983_v34, 5  ;;  %v451_v48 = vpack.c.b16 %v441_v30, %v440_v29 }
  0x6a   : > { %v386_v49 = vor.u32 %v385_v38, %v382_v37  ;;  %v399_v51 = vshll.u32 %v230_v41, 16  ;;  %v999_v57 = vshll.u32 %v1559_v52, 16  ;;  %v407_v6 = vshll.u32 %v220_v62, 16  ;;  %v1605_v37 = vld [vmem:[%s2026_s8 + $0x60] sm:$0xff]  ;;  %v1595_v38 = vld [vmem:[%s2026_s8 + $0x54] sm:$0xff] }
  0x6b   : > { %v1051_v53 = vpack.c.b16 %v1041_v43, %v1040_v42  ;;  %v986_v55 = vor.u32 %v985_v45, %v982_v44  ;;  %v413_v7 = vshll.u32 %v221_v63, 16  ;;  %v417_v8 = vshrl.u32 %v221_v63, 16 }
  0x6c   : > { %1426 = vmatmul.msk.bf16.gmra.mxu0 %vm460_vm0, %v449_v16  ;;  %v219_v16 = vld [vmem:[%s2026_s8 + $0x4c] sm:$0xf]  ;;  %v387_v59 = vrot.slane %v386_v49, 4  ;;  %v401_v61 = vrot.slane %v399_v51, 5  ;;  %v1001_v2 = vrot.slane %v999_v57, 5  ;;  %v409_v20 = vrot.slane %v407_v6, 5 }
  0x6d   : > { %v987_v0 = vrot.slane %v986_v55, 4  ;;  %v415_v21 = vrot.slane %v413_v7, 5  ;;  %v419_v22 = vrot.slane %v417_v8, 4  ;;  %v423_v34 = vshll.u32 %v231_v23, 16 }
  0x6e   : > { %1535 = vmatmul.msk.bf16.gmra.mxu2 %vm460_vm0, %v1602_v25  ;;  %1471 = vmatmul.msk.bf16.gmra.mxu1 %vm460_vm0, %v1592_v28  ;;  %v393_v25 = vshrl.u32 %v219_v16, 16  ;;  %v1558_v28 = vld [vmem:[%s2026_s8 + $0x58] sm:$0xf] }
  0x6f   : > { %1572 = vmatmul.msk.bf16.gmra.mxu3 %vm460_vm0, %v1049_v24  ;;  %v389_v24 = vshll.u32 %v219_v16, 16  ;;  %v989_v35 = vshll.u32 %v1558_v28, 16  ;;  %v993_v36 = vshrl.u32 %v1558_v28, 16  ;;  %v420_v33 = vor.u32 %v419_v22, %v415_v21 }
  0x70   : > { %v395_v40 = vrot.slane %v393_v25, 4  ;;  %v425_v44 = vrot.slane %v423_v34, 5 }
  0x71   : > { %v391_v39 = vrot.slane %v389_v24, 5  ;;  %v991_v46 = vrot.slane %v989_v35, 5  ;;  %v995_v47 = vrot.slane %v993_v36, 4  ;;  %v1562_v35 = vld [vmem:[%s2026_s8 + $0x68] sm:$0x1]  ;;  %v421_v43 = vrot.slane %v420_v33, 4 }
  0x72   : > { %v1023_v41 = vshll.u32 %v1562_v35, 16 }
  0x73   : > { %v396_v50 = vor.u32 %v395_v40, %v391_v39  ;;  %v996_v56 = vor.u32 %v995_v47, %v991_v46  ;;  %v392_v3 = vsel %vm2041_vm3, %v387_v59, %v391_v39  ;;  %v992_v13 = vsel %vm2041_vm3, %v987_v0, %v991_v46 }
  0x74   : > { %v442_v11 = vunpack.c.l.b16 %v392_v3  ;;  %v1042_v25 = vunpack.c.l.b16 %v992_v13  ;;  %v1025_v47 = vrot.slane %v1023_v41, 5  ;;  %v426_v49 = vsel %vm2041_vm3, %v421_v43, %v425_v44 }
  0x75   : > { %v397_v60 = vrot.slane %v396_v50, 4  ;;  %v997_v1 = vrot.slane %v996_v56, 4  ;;  %v445_v51 = vunpack.c.l.b16 %v426_v49 }
  0x77   : > { %v402_v4 = vsel %vm2041_vm3, %v397_v60, %v401_v61 }
  0x78   : > { %v443_v12 = vunpack.c.l.b16 %v402_v4 }
  0x7a   : > { %v452_v24 = vpack.c.b16 %v443_v12, %v442_v11 }
  0x7c   : > { %1427 = vmatmul.msk.bf16.gmra.mxu0 %vm460_vm0, %v450_v5  ;;  %v404_v5 = vshrl.u32 %v220_v62, 16 }
  0x7e   : > { %1536 = vmatmul.msk.bf16.gmra.mxu2 %vm460_vm0, %v1603_v10  ;;  %1472 = vmatmul.msk.bf16.gmra.mxu1 %vm460_vm0, %v1593_v14  ;;  %v1561_v10 = vld [vmem:[%s2026_s8 + $0x64] sm:$0xf]  ;;  %v1002_v14 = vsel %vm2041_vm3, %v997_v1, %v1001_v2  ;;  %v406_v19 = vrot.slane %v404_v5, 4 }
  0x7f   : > { %1573 = vmatmul.msk.bf16.gmra.mxu3 %vm460_vm0, %v1050_v9  ;;  %v1560_v9 = vld [vmem:[%s2026_s8 + $0x60] sm:$0xf]  ;;  %v1013_v17 = vshll.u32 %v1561_v10, 16  ;;  %v1017_v18 = vshrl.u32 %v1561_v10, 16  ;;  %v1043_v26 = vunpack.c.l.b16 %v1002_v14  ;;  %s1268_s8 = sshll.u32 %s2199_s4, 4  ;;  %s1269_s8 = int_to_ptr.vmem [resolvable:$true] %s1268_s8 }
  0x80   : > { %v1004_v15 = vshrl.u32 %v1560_v9, 16  ;;  %v1007_v16 = vshll.u32 %v1560_v9, 16  ;;  %v410_v32 = vor.u32 %v409_v20, %v406_v19 }
  0x81   : > { %v1015_v30 = vrot.slane %v1013_v17, 5  ;;  %v1019_v31 = vrot.slane %v1017_v18, 4  ;;  %v1052_v36 = vpack.c.b16 %v1043_v26, %v1042_v25 }
  0x82   : > { %v1006_v28 = vrot.slane %v1004_v15, 4  ;;  %v1009_v29 = vrot.slane %v1007_v16, 5  ;;  %v411_v42 = vrot.slane %v410_v32, 4 }
  0x83   : > { %v1020_v40 = vor.u32 %v1019_v31, %v1015_v30 }
  0x84   : > { %v1010_v39 = vor.u32 %v1009_v29, %v1006_v28 }
  0x85   : > { %v1021_v46 = vrot.slane %v1020_v40, 4 }
  0x86   : > { %v1011_v45 = vrot.slane %v1010_v39, 4 }
  0x88   : > { %v1016_v52 = vsel %vm2041_vm3, %v1011_v45, %v1015_v30 }
  0x8c   : > { %1428 = vmatmul.msk.bf16.gmra.mxu0 %vm460_vm0, %v451_v48  ;;  %v416_v48 = vsel %vm2041_vm3, %v411_v42, %v415_v21 }
  0x8d   : > { %v444_v50 = vunpack.c.l.b16 %v416_v48 }
  0x8e   : > { %1537 = vmatmul.msk.bf16.gmra.mxu2 %vm460_vm0, %v1604_v54  ;;  %1473 = vmatmul.msk.bf16.gmra.mxu1 %vm460_vm0, %v1594_v58  ;;  %v1044_v54 = vunpack.c.l.b16 %v1016_v52 }
  0x8f   : > { %1574 = vmatmul.msk.bf16.gmra.mxu3 %vm460_vm0, %v1051_v53  ;;  %v1026_v53 = vsel %vm2041_vm3, %v1021_v46, %v1025_v47  ;;  %v453_v56 = vpack.c.b16 %v445_v51, %v444_v50 }
  0x90   : > { %v1045_v55 = vunpack.c.l.b16 %v1026_v53 }
  0x92   : > { %v1053_v57 = vpack.c.b16 %v1045_v55, %v1044_v54 }
  0x9c   : > { %1429 = vmatmul.msk.bf16.gmra.mxu0 %vm460_vm0, %v452_v24 }
  0x9e   : > { %1538 = vmatmul.msk.bf16.gmra.mxu2 %vm460_vm0, %v1605_v37  ;;  %1474 = vmatmul.msk.bf16.gmra.mxu1 %vm460_vm0, %v1595_v38 }
  0x9f   : > { %1575 = vmatmul.msk.bf16.gmra.mxu3 %vm460_vm0, %v1052_v36 }
  0xab   : > { %v613_v58 = vpop.f32.mrf.mxu1 }
  0xac   : > { %1430 = vmatmul.msk.bf16.gmra.mxu0 %vm460_vm0, %v453_v56 }
  0xaf   : > { %1576 = vmatmul.msk.bf16.gmra.mxu3 %vm460_vm0, %v1053_v57 }
  0xb1   : > { %v755_v59 = vpop.f32.mrf.mxu2 }
  0xb3   : > { %v615_v60 = vpop.f32.mrf.mxu1 }
  0xb9   : > { %v494_v61 = vpop.f32.mrf.mxu0  ;;  %v757_v62 = vpop.f32.mrf.mxu2 }
  0xba   : > { %v614_v63 = vadd.f32 %v613_v58, %v494_v61 }
  0xbb   : > { %v618_v0 = vpop.f32.mrf.mxu1 }
  0xbc   : > { %v795_v27 = vadd.f32 %v755_v59, %v614_v63 }
  0xc1   : > { %v496_v1 = vpop.f32.mrf.mxu0  ;;  %v760_v3 = vpop.f32.mrf.mxu2 }
  0xc2   : > { %v1093_v2 = vpop.f32.mrf.mxu3  ;;  %v616_v5 = vadd.f32 %v615_v60, %v496_v1 }
  0xc3   : > { %v2197_v4 = vadd.f32 %v1093_v2, %v795_v27  ;;  %v620_v6 = vpop.f32.mrf.mxu1 }
  0xc4   : > { %v796_v7 = vadd.f32 %v757_v62, %v616_v5 }
  0xc5   : > { %1149 = vst [vmem:[%s2199_s4] sm:$0xff] %v2197_v4 }
  0xc9   : > { %v499_v8 = vpop.f32.mrf.mxu0  ;;  %v762_v10 = vpop.f32.mrf.mxu2 }
  0xca   : > { %v1095_v9 = vpop.f32.mrf.mxu3  ;;  %v619_v12 = vadd.f32 %v618_v0, %v499_v8 }
  0xcb   : > { %v2203_v11 = vadd.f32 %v1095_v9, %v796_v7  ;;  %v623_v13 = vpop.f32.mrf.mxu1 }
  0xcc   : > { %v797_v14 = vadd.f32 %v760_v3, %v619_v12 }
  0xcd   : > { %1150 = vst [vmem:[%s2199_s4 + $0x8] sm:$0xff] %v2203_v11 }
  0xd1   : > { %v501_v15 = vpop.f32.mrf.mxu0  ;;  %v765_v17 = vpop.f32.mrf.mxu2 }
  0xd2   : > { %v1098_v16 = vpop.f32.mrf.mxu3  ;;  %v621_v19 = vadd.f32 %v620_v6, %v501_v15 }
  0xd3   : > { %v2207_v18 = vadd.f32 %v1098_v16, %v797_v14  ;;  %v625_v20 = vpop.f32.mrf.mxu1 }
  0xd4   : > { %v798_v21 = vadd.f32 %v762_v10, %v621_v19 }
  0xd5   : > { %1151 = vst [vmem:[%s2199_s4 + $0x10] sm:$0xff] %v2207_v18 }
  0xd9   : > { %v504_v22 = vpop.f32.mrf.mxu0  ;;  %v767_v24 = vpop.f32.mrf.mxu2 }
  0xda   : > { %v1100_v23 = vpop.f32.mrf.mxu3  ;;  %v624_v26 = vadd.f32 %v623_v13, %v504_v22  ;;  %v1165_v22 = vadd.f32 %v2203_v11, %v2197_v4 }
  0xdb   : > { %v2211_v25 = vadd.f32 %v1100_v23, %v798_v21  ;;  %v628_v28 = vpop.f32.mrf.mxu1 }
  0xdc   : > { %v799_v29 = vadd.f32 %v765_v17, %v624_v26  ;;  %v1166_v26 = vadd.f32 %v1165_v22, %v2207_v18 }
  0xdd   : > { %1152 = vst [vmem:[%s2199_s4 + $0x18] sm:$0xff] %v2211_v25 }
  0xe1   : > { %v506_v30 = vpop.f32.mrf.mxu0  ;;  %v770_v32 = vpop.f32.mrf.mxu2 }
  0xe2   : > { %v1103_v31 = vpop.f32.mrf.mxu3  ;;  %v626_v34 = vadd.f32 %v625_v20, %v506_v30  ;;  %v1167_v30 = vadd.f32 %v1166_v26, %v2211_v25 }
  0xe3   : > { %v2215_v33 = vadd.f32 %v1103_v31, %v799_v29  ;;  %v630_v35 = vpop.f32.mrf.mxu1 }
  0xe4   : > { %v800_v36 = vadd.f32 %v767_v24, %v626_v34 }
  0xe5   : > { %1153 = vst [vmem:[%s2199_s4 + $0x20] sm:$0xff] %v2215_v33 }
  0xe9   : > { %v509_v37 = vpop.f32.mrf.mxu0  ;;  %v772_v39 = vpop.f32.mrf.mxu2 }
  0xea   : > { %v1105_v38 = vpop.f32.mrf.mxu3  ;;  %v629_v41 = vadd.f32 %v628_v28, %v509_v37 }
  0xeb   : > { %v2219_v40 = vadd.f32 %v1105_v38, %v800_v36  ;;  %v633_v42 = vpop.f32.mrf.mxu1 }
  0xec   : > { %v801_v43 = vadd.f32 %v770_v32, %v629_v41  ;;  %v1168_v32 = vadd.f32 %v1167_v30, %v2215_v33 }
  0xed   : > { %1154 = vst [vmem:[%s2199_s4 + $0x28] sm:$0xff] %v2219_v40 }
  0xee   : > { %v1169_v34 = vadd.f32 %v1168_v32, %v2219_v40 }
  0xf1   : > { %v511_v44 = vpop.f32.mrf.mxu0  ;;  %v775_v46 = vpop.f32.mrf.mxu2 }
  0xf2   : > { %v1108_v45 = vpop.f32.mrf.mxu3  ;;  %v631_v48 = vadd.f32 %v630_v35, %v511_v44 }
  0xf3   : > { %v2223_v47 = vadd.f32 %v1108_v45, %v801_v43  ;;  %v635_v49 = vpop.f32.mrf.mxu1 }
  0xf4   : > { %v802_v50 = vadd.f32 %v772_v39, %v631_v48 }
  0xf5   : > { %1155 = vst [vmem:[%s2199_s4 + $0x30] sm:$0xff] %v2223_v47  ;;  %v1170_v39 = vadd.f32 %v1169_v34, %v2223_v47 }
  0xf9   : > { %v514_v51 = vpop.f32.mrf.mxu0  ;;  %v777_v55 = vpop.f32.mrf.mxu2 }
  0xfa   : > { %v1110_v52 = vpop.f32.mrf.mxu3  ;;  %v634_v54 = vadd.f32 %v633_v42, %v514_v51 }
  0xfb   : > { %v2227_v53 = vadd.f32 %v1110_v52, %v802_v50  ;;  %v638_v59 = vpop.f32.mrf.mxu1 }
  0xfc   : > { %v803_v56 = vadd.f32 %v775_v46, %v634_v54 }
  0xfd   : > { %1156 = vst [vmem:[%s2199_s4 + $0x38] sm:$0xff] %v2227_v53  ;;  %v1171_v43 = vadd.f32 %v1170_v39, %v2227_v53 }
 0x101   : > { %v516_v57 = vpop.f32.mrf.mxu0  ;;  %v780_v62 = vpop.f32.mrf.mxu2 }
 0x102   : > { %v1113_v58 = vpop.f32.mrf.mxu3  ;;  %v636_v61 = vadd.f32 %v635_v49, %v516_v57 }
 0x103   : > { %v2231_v60 = vadd.f32 %v1113_v58, %v803_v56  ;;  %v640_v3 = vpop.f32.mrf.mxu1 }
 0x104   : > { %v804_v63 = vadd.f32 %v777_v55, %v636_v61 }
 0x105   : > { %1157 = vst [vmem:[%s2199_s4 + $0x40] sm:$0xff] %v2231_v60  ;;  %v1172_v45 = vadd.f32 %v1171_v43, %v2231_v60 }
 0x109   : > { %v519_v0 = vpop.f32.mrf.mxu0  ;;  %v782_v6 = vpop.f32.mrf.mxu2 }
 0x10a   : > { %v1115_v27 = vpop.f32.mrf.mxu3  ;;  %v639_v2 = vadd.f32 %v638_v59, %v519_v0 }
 0x10b   : > { %v2235_v1 = vadd.f32 %v1115_v27, %v804_v63  ;;  %v643_v12 = vpop.f32.mrf.mxu1 }
 0x10c   : > { %v805_v5 = vadd.f32 %v780_v62, %v639_v2 }
 0x10d   : > { %1158 = vst [vmem:[%s2199_s4 + $0x48] sm:$0xff] %v2235_v1  ;;  %v1173_v48 = vadd.f32 %v1172_v45, %v2235_v1 }
 0x111   : > { %v521_v7 = vpop.f32.mrf.mxu0  ;;  %v785_v15 = vpop.f32.mrf.mxu2 }
 0x112   : > { %v1118_v8 = vpop.f32.mrf.mxu3  ;;  %v641_v10 = vadd.f32 %v640_v3, %v521_v7 }
 0x113   : > { %v2239_v9 = vadd.f32 %v1118_v8, %v805_v5  ;;  %v645_v21 = vpop.f32.mrf.mxu1 }
 0x114   : > { %v806_v13 = vadd.f32 %v782_v6, %v641_v10 }
 0x115   : > { %1159 = vst [vmem:[%s2199_s4 + $0x50] sm:$0xff] %v2239_v9  ;;  %v1174_v51 = vadd.f32 %v1173_v48, %v2239_v9 }
 0x119   : > { %v524_v14 = vpop.f32.mrf.mxu0  ;;  %v787_v29 = vpop.f32.mrf.mxu2 }
 0x11a   : > { %v1120_v16 = vpop.f32.mrf.mxu3  ;;  %v644_v19 = vadd.f32 %v643_v12, %v524_v14 }
 0x11b   : > { %v2243_v17 = vadd.f32 %v1120_v16, %v806_v13  ;;  %v648_v37 = vpop.f32.mrf.mxu1 }
 0x11c   : > { %v807_v20 = vadd.f32 %v785_v15, %v644_v19 }
 0x11d   : > { %1160 = vst [vmem:[%s2199_s4 + $0x58] sm:$0xff] %v2243_v17  ;;  %v1175_v55 = vadd.f32 %v1174_v51, %v2243_v17 }
 0x121   : > { %v526_v23 = vpop.f32.mrf.mxu0  ;;  %v790_v44 = vpop.f32.mrf.mxu2 }
 0x122   : > { %v1123_v24 = vpop.f32.mrf.mxu3  ;;  %v646_v31 = vadd.f32 %v645_v21, %v526_v23 }
 0x123   : > { %v2250_v28 = vadd.f32 %v1123_v24, %v807_v20  ;;  %v650_v54 = vpop.f32.mrf.mxu1 }
 0x124   : > { %v808_v35 = vadd.f32 %v787_v29, %v646_v31 }
 0x125   : > { %1161 = vst [vmem:[%s2199_s4 + $0x60] sm:$0xff] %v2250_v28  ;;  %v1176_v57 = vadd.f32 %v1175_v55, %v2250_v28 }
 0x129   : > { %v529_v36 = vpop.f32.mrf.mxu0  ;;  %v792_v58 = vpop.f32.mrf.mxu2 }
 0x12a   : > { %v1125_v38 = vpop.f32.mrf.mxu3  ;;  %v649_v42 = vadd.f32 %v648_v37, %v529_v36 }
 0x12b   : > { %v2258_v41 = vadd.f32 %v1125_v38, %v808_v35 }
 0x12c   : > { %v809_v46 = vadd.f32 %v790_v44, %v649_v42 }
 0x12d   : > { %1162 = vst [vmem:[%s2199_s4 + $0x68] sm:$0xff] %v2258_v41  ;;  %v1177_v59 = vadd.f32 %v1176_v57, %v2258_v41 }
 0x131   : > { %v531_v50 = vpop.f32.mrf.mxu0 }
 0x132   : > { %v1128_v49 = vpop.f32.mrf.mxu3  ;;  %v651_v56 = vadd.f32 %v650_v54, %v531_v50 }
 0x133   : > { %v2268_v52 = vadd.f32 %v1128_v49, %v809_v46 }
 0x134   : > { %v810_v61 = vadd.f32 %v792_v58, %v651_v56 }
 0x135   : > { %1163 = vst [vmem:[%s2199_s4 + $0x70] sm:$0xff] %v2268_v52  ;;  %v1178_v63 = vadd.f32 %v1177_v59, %v2268_v52 }
 0x13a   : > { %v1130_v62 = vpop.f32.mrf.mxu3 }
 0x13b   : > { %v2280_v0 = vadd.f32 %v1130_v62, %v810_v61 }
 0x13d   : > { %1164 = vst [vmem:[%s2199_s4 + $0x78] sm:$0xff] %v2280_v0  ;;  %v1179_v27 = vadd.f32 %v1178_v63, %v2280_v0 }
 0x13e   : > { %1739 = shalt.err (!%p1736_p12)
}
 0x13f   : > { %s1864_s26 = smov 128   ;;  %s1865_s4 = smov 8   ;;  %v1180_v2 = vrot.slane %v1179_v27, 4 }
 0x140   : > { %1610 = dma.vmem_to_hbm [thread:$0]  (%p1959_p3), %s1269_s8, 2048, %s1271_s9, %s1248_s10, %s1864_s26, %s1864_s26, %s1865_s4  }
 0x141   : > { %v1181_v3 = vadd.f32 %v1180_v2, %v1179_v27  ;;  %s1583_s0 = sshll.u32 %s1850_s19, 1  ;;  %s190_s30 = sand.u32 1, %s1826_s13  }
 0x142   : > { %s1281_s8 = sadd.s32 %s1846_s18, %s1583_s0  ;;  %s1412_s9 = sshll.u32 %s190_s30, 3 }
 0x143   : > { %v1182_v5 = vrot.slane %v1181_v3, 2  ;;  %s1584_s10 = sshll.u32 %s1281_s8, 3  ;;  %s2393_s24 = sld [smem:[#allocation11_spill]] }
 0x144   : > { %s192_s7 = scalar_lea.vmem [#allocation4], %s1412_s9  ;;  %s1253_s18 = scalar_lea.sflag [#allocation5], %s190_s30 }
 0x145   : > { %v1183_v6 = vadd.f32 %v1182_v5, %v1181_v3  ;;  %s1287_s19 = sshll.u32 %s192_s7, 4  ;;  %s1288_s19 = int_to_ptr.vmem [resolvable:$true] %s1287_s19 }
 0x147   : > { %v1184_v7 = vrot.slane %v1183_v6, 1 }
 0x149   : > { %v2297_v8 = vadd.f32 %v1184_v7, %v1183_v6  ;;  %s1285_s27 = scalar_lea.hbm %s2393_s24, %s1584_s10  ;;  %s1760_s9 = scalar_lea.hbm %s2393_s24, 32 }
 0x14a   : > { %s1289_s28 = sshll.u32 %s1285_s27, 4  ;;  %s1290_s28 = int_to_ptr.hbm [resolvable:$true] %s1289_s28 }
 0x14b   : > { %v1186_v10 = vmul.f32 0.0078125, %v2297_v8  ;;  %s1754_s26 = sshra.s32 %s1290_s28, 4  ;;  %s1755_s26 = int_to_ptr.hbm [resolvable:$true] %s1754_s26 }
 0x14c   : > { %s1756_s4 = scalar_lea.hbm %s1755_s26, 8  ;;  %p1761_p5 = scmp.lt.s32.totalorder %s1755_s26, %s2393_s24 }
 0x14d   : > { %v1187_v12 = vsub.f32 %v2197_v4, %v1186_v10  ;;  %v1188_v13 = vsub.f32 %v2203_v11, %v1186_v10  ;;  %v1189_v14 = vsub.f32 %v2207_v18, %v1186_v10  ;;  %v1190_v19 = vsub.f32 %v2211_v25, %v1186_v10  ;;  %p1757_p3 = scmp.ne.s32.totalorder %s1755_s26, %s1756_s4  ;;  %p1762_p2 = scmp.lt.s32.totalorder %s1760_s9, %s1756_s4 }
 0x14e   : > { %v1191_v20 = vsub.f32 %v2215_v33, %v1186_v10  ;;  %v1192_v23 = vsub.f32 %v2219_v40, %v1186_v10  ;;  %v1193_v29 = vsub.f32 %v2223_v47, %v1186_v10  ;;  %v1194_v11 = vsub.f32 %v2227_v53, %v1186_v10 }
 0x14f   : > { %v1203_v15 = vmul.f32 %v1187_v12, %v1187_v12  ;;  %v1204_v16 = vmul.f32 %v1188_v13, %v1188_v13  ;;  %v1205_v21 = vmul.f32 %v1189_v14, %v1189_v14  ;;  %v1206_v24 = vmul.f32 %v1190_v19, %v1190_v19  ;;  %p1758_p13 = pnand %p1757_p3, %p1998_p0  ;;  %p1763_p6 = por %p1762_p2, %p1761_p5 }
 0x150   : > { %v1207_v30 = vmul.f32 %v1191_v20, %v1191_v20  ;;  %v1208_v31 = vmul.f32 %v1192_v23, %v1192_v23  ;;  %v1195_v32 = vsub.f32 %v2231_v60, %v1186_v10  ;;  %v1209_v34 = vmul.f32 %v1193_v29, %v1193_v29 }
 0x151   : > { %v1219_v22 = vadd.f32 %v1204_v16, %v1203_v15  ;;  %v1196_v33 = vsub.f32 %v2235_v1, %v1186_v10  ;;  %v1210_v35 = vmul.f32 %v1194_v11, %v1194_v11  ;;  %v1197_v40 = vsub.f32 %v2239_v9, %v1186_v10  ;;  %p1759_p4 = pneg %p1758_p13 }
 0x152   : > { %v1211_v37 = vmul.f32 %v1195_v32, %v1195_v32  ;;  %v1198_v47 = vsub.f32 %v2243_v17, %v1186_v10  ;;  %v1199_v53 = vsub.f32 %v2250_v28, %v1186_v10  ;;  %v1200_v60 = vsub.f32 %v2258_v41, %v1186_v10 }
 0x153   : > { %v1220_v26 = vadd.f32 %v1219_v22, %v1205_v21  ;;  %v1212_v39 = vmul.f32 %v1196_v33, %v1196_v33  ;;  %v1213_v43 = vmul.f32 %v1197_v40, %v1197_v40  ;;  %v1201_v46 = vsub.f32 %v2268_v52, %v1186_v10  ;;  %p1764_p8 = pnand %p1763_p6, %p1759_p4 }
 0x154   : > { %v1214_v45 = vmul.f32 %v1198_v47, %v1198_v47  ;;  %v1215_v9 = vmul.f32 %v1199_v53, %v1199_v53  ;;  %v1202_v49 = vsub.f32 %v2280_v0, %v1186_v10  ;;  %v1216_v17 = vmul.f32 %v1200_v60, %v1200_v60 }
 0x155   : > { %v1221_v4 = vadd.f32 %v1220_v26, %v1206_v24  ;;  %v1217_v51 = vmul.f32 %v1201_v46, %v1201_v46  ;;  %v1240_v41 = vlaneseq }
 0x156   : > { %v1218_v28 = vmul.f32 %v1202_v49, %v1202_v49 }
 0x157   : > { %v1222_v18 = vadd.f32 %v1221_v4, %v1207_v30  ;;  %v1241_v59 = vshrl.u32 %v1240_v41, 7 }
 0x159   : > { %v1223_v25 = vadd.f32 %v1222_v18, %v1208_v31  ;;  %vm1243_vm4 = vcmp.eq.s32.totalorder %v1241_v59, 1  ;;  %vm1242_vm5 = vcmp.eq.s32.totalorder %v1241_v59, 0 }
 0x15b   : > { %v1224_v36 = vadd.f32 %v1223_v25, %v1209_v34 }
 0x15d   : > { %v1225_v38 = vadd.f32 %v1224_v36, %v1210_v35 }
 0x15f   : > { %v1226_v42 = vadd.f32 %v1225_v38, %v1211_v37 }
 0x161   : > { %v1227_v44 = vadd.f32 %v1226_v42, %v1212_v39 }
 0x163   : > { %v1228_v1 = vadd.f32 %v1227_v44, %v1213_v43 }
 0x165   : > { %v1229_v48 = vadd.f32 %v1228_v1, %v1214_v45 }
 0x167   : > { %v1230_v50 = vadd.f32 %v1229_v48, %v1215_v9 }
 0x169   : > { %v1231_v54 = vadd.f32 %v1230_v50, %v1216_v17 }
 0x16b   : > { %v1232_v55 = vadd.f32 %v1231_v54, %v1217_v51 }
 0x16d   : > { %v1233_v56 = vadd.f32 %v1232_v55, %v1218_v28 }
 0x16f   : > { %v1234_v57 = vrot.slane %v1233_v56, 4 }
 0x171   : > { %v1235_v58 = vadd.f32 %v1234_v57, %v1233_v56 }
 0x173   : > { %v1236_v52 = vrot.slane %v1235_v58, 2 }
 0x175   : > { %v1237_v61 = vadd.f32 %v1236_v52, %v1235_v58 }
 0x177   : > { %v1238_v62 = vrot.slane %v1237_v61, 1 }
 0x179   : > { %v1239_v63 = vadd.f32 %v1238_v62, %v1237_v61 }
 0x17b   : > { %v1244_v0 = vsel %vm1243_vm4, %v1239_v63, 0.0 }
 0x17c   : > { %v1245_v27 = vsel %vm1242_vm5, %v2297_v8, %v1244_v0 }
 0x17d   : > { %1246 = vst [vmem:[%s192_s7] sm:$0xff] %v1245_v27 }
 0x17e   : > { %1767 = shalt.err (!%p1764_p8)
}
 0x17f   : > { %1611 = dma.vmem_to_hbm [thread:$0]  (%p1998_p0), %s1288_s19, 128, %s1290_s28, %s1253_s18  }
 0x180 PF: > { %s2394_s30 = sld [smem:[#allocation8_spill]]  ;;  %p1621_p9 = scmp.ge.s32.totalorder %s1862_s22, 2 }
 0x182   : > { %p1615_p10 = pnand %p1621_p9, %p1974_p7 }
 0x184   : > { %p1616_p11 = pneg %p1615_p10 }
 0x186   : > { %s1301_s23 = sand.u32 1, %s2394_s30  }
 0x187   : > { %s1302_s27 = scalar_lea.sflag [#allocation3], %s1301_s23 }
 0x188   : > { %1813 = dma.done.wait (%p1616_p11), %s1302_s27, 2048  }
 0x189   : > { %1815 = vsyncadd (%p1616_p11), %s1302_s27, 4294965248  ;;  %s1311_s7 = sand.u32 1, %s1822_s12   ;;  %p1618_p12 = pnand %p1621_p9, %p2004_p1 }
 0x18a   : > { %s1312_s5 = scalar_lea.sflag [#allocation5], %s1311_s7 }
 0x18b   : > { %p1619_p3 = pneg %p1618_p12 }
 0x18d   : > { %1817 = dma.done.wait (%p1619_p3), %s1312_s5, 128  }
 0x18e   : > { %1819 = vsyncadd (%p1619_p3), %s1312_s5, 4294967168  ;;  %s20_s22 = sadd.s32 1, %s1862_s22   ;;  %s2395_s6 = smov %s1985_s15 }
 0x18f   : > { %p17_p0 = scmp.ge.s32.totalorder %s20_s22, 6   ;;  %s2396_s28 = sld [smem:[#allocation9_spill]] }
 0x190   : > { %s2397_s12 = smov %s1826_s13  ;;  %s2398_s13 = smov %s1830_s14 }
 0x191   : > { %s2399_s14 = smov %s1988_s3  ;;  %s2400_s15 = smov %s1838_s16 }
 0x192   : > { %s2401_s16 = smov %s1842_s17  ;;  %s2402_s17 = smov %s2395_s6 }
 0x193   : > { %s2403_s18 = smov %s1854_s20  ;;  %s2404_s19 = smov %s1858_s21 }
 0x194   : > { %s2405_s20 = smov %s2408_s25  ;;  %19 = sbr.rel (!%p17_p0) target bundleno = 12 (0xc), region = 85 }
 0x195   : > { %s2406_s21 = smov %s2396_s28 }
 0x199   :  { %1318 = vsyncpa [#allocation3], 1 }
 0x19a   :  { %1320 = vsyncpa [#allocation3 + $0x1], 1 }
 0x19b   :  { %1321 = vsyncpa [#allocation5], 1 }
 0x19c   :  { %1323 = vsyncpa [#allocation5 + $0x1], 1 }

// kernel: tpu_custom_call.1
= control target key start
LH: loop header
LB: loop body
LE: loop exit
PB: predicated region body
PF: predicated region fallthrough
CT: control target
= control target key end

     0   :  { %s2373_s0 = inlined_call_operand.vmem [shape: bf16[2,17,17,16], index: 0, kind: input, shape index: {}]   ;;  %s2374_s1 = inlined_call_operand.vmem [shape: bf16[4,16,128], index: 1, kind: input, shape index: {}]   ;;  %s2375_s2 = inlined_call_operand.hbm [shape: f32[2,16,16,128], index: 2, kind: output, shape index: {0}]   ;;  %s2376_s3 = inlined_call_operand.hbm [shape: f32[32,128], index: 3, kind: output, shape index: {1}]  }
   0x1   :  { %2380 = sst [smem:[#allocation10_spill]] %s2373_s0 }
   0x2   :  { %2381 = sst [smem:[#allocation11_spill]] %s2376_s3 }
   0x3   :  { %9 = vsyncpa [#allocation3], 0 }
   0x4   :  { %11 = vsyncpa [#allocation3 + $0x1], 0 }
   0x5   :  { %12 = vsyncpa [#allocation5], 0 }
   0x6   :  { %14 = vsyncpa [#allocation5 + $0x1], 0  ;;  %s1886_s12 = smov 0   ;;  %s1888_s13 = smov 0  }
   0x7   :  { %s1890_s14 = smov 0   ;;  %s1892_s15 = smov 0  }
   0x8   :  { %s1894_s16 = smov 0   ;;  %s1896_s17 = smov 0  }
   0x9   :  { %s1898_s18 = smov 0   ;;  %s1900_s19 = smov 0  }
   0xa   :  { %s1902_s20 = smov 0   ;;  %s1904_s21 = smov 0  }
   0xb   :  { %s1906_s22 = smov 0  }
   0xc LB: > { %2382 = sst [smem:[#allocation8_spill]] %s1834_s15  ;;  %s1404_s23 = sadd.s32 4294967295, %s1862_s22   ;;  %s1862_s22 = sphi %s1906_s22, %s20_s22   ;;  %s1858_s21 = sphi %s1904_s21, %s2406_s21   ;;  %s1854_s20 = sphi %s1902_s20, %s2405_s20   ;;  %s1850_s19 = sphi %s1900_s19, %s2404_s19   ;;  %s1846_s18 = sphi %s1898_s18, %s2403_s18   ;;  %s1842_s17 = sphi %s1896_s17, %s2402_s17   ;;  %s1838_s16 = sphi %s1894_s16, %s2401_s16   ;;  %s1834_s15 = sphi %s1892_s15, %s2400_s15   ;;  %s1830_s14 = sphi %s1890_s14, %s2399_s14   ;;  %s1826_s13 = sphi %s1888_s13, %s2398_s13   ;;  %s1822_s12 = sphi %s1886_s12, %s2397_s12  }
   0xd   : > { %s1405_s24 = sadd.s32 4294967294, %s1862_s22   ;;  %s29_s25 = sadd.s32 1, %s1854_s20 }
   0xe   : > { %s32_s26 = sadd.s32 1, %s1858_s21  ;;  %p30_p0 = scmp.ge.s32.totalorder %s29_s25, 2 }
   0xf   : > { %s88_s27 = sadd.s32 1, %s1842_s17  ;;  %p98_p1 = scmp.ne.s32.totalorder %s1842_s17, %s1838_s16 }
  0x10   : > { %p1948_p2 = scmp.eq.s32.totalorder %s1404_s23, 3  ;;  %s2408_s25 = smov (%p30_p0, %s29_s25), 0 }
  0x11   : > { %s2410_s26 = smov (!%p30_p0, %s32_s26), %s1858_s21  ;;  %s84_s29 = ssub.s32 %s1854_s20, %s2408_s25 }
  0x12   : > { %p1959_p3 = por %p1948_p2, %p98_p1  ;;  %p34_p4 = scmp.ge.s32.totalorder %s2410_s26, 2 }
  0x13   : > { %p104_p5 = scmp.ne.s32.totalorder %s1838_s16, %s1834_s15  ;;  %p1965_p6 = scmp.eq.s32.totalorder %s1405_s24, 3 }
  0x14   : > { %s1406_s5 = sshll.u32 %s1858_s21, 1  ;;  %s2412_s26 = smov (%p34_p4, %s2410_s26), 0 }
  0x15   : > { %2386 = sst [smem:[#allocation9_spill]] %s2412_s26  ;;  %p1974_p7 = por %p1965_p6, %p104_p5 }
  0x16   : > { %s112_s7 = sadd.s32 %s1854_s20, %s1406_s5  ;;  %s83_s8 = ssub.s32 %s1858_s21, %s2412_s26 }
  0x17   : > { %s1407_s9 = sshll.u32 %s2412_s26, 1  ;;  %s85_s10 = sor.u32 %s84_s29, %s83_s8 }
  0x18   : > { %s114_s11 = sadd.s32 %s1407_s9, %s2408_s25  ;;  %p86_p8 = scmp.eq.s32.totalorder %s85_s10, 0 }
  0x19   : > { %s115_s23 = ssub.s32 %s112_s7, %s114_s11  ;;  %s118_s24 = sadd.s32 1, %s1830_s14 }
  0x1a   : > { %p116_p9 = scmp.eq.s32.totalorder %s115_s23, 0  ;;  %p128_p10 = scmp.ne.s32.totalorder %s1830_s14, %s1826_s13 }
  0x1b   : > { %s1985_s15 = scalar_select %p86_p8, %s1842_s17, %s88_s27  }
  0x1c   : > { %s1988_s3 = scalar_select %p116_p9, %s1830_s14, %s118_s24  }
  0x1d   : > { %p134_p11 = scmp.ne.s32.totalorder %s1826_s13, %s1822_s12  ;;  %p1410_p12 = scmp.ge.s32.totalorder %s1862_s22, 1 }
  0x1e   : > { %p164_p13 = scmp.lt.s32.totalorder %s1862_s22, 5  ;;  %p1998_p0 = por %p128_p10, %p1948_p2 }
  0x1f   : > { %p2004_p1 = por %p134_p11, %p1965_p6 }
  0x20   : > { %p165_p4 = pnand %p1410_p12, %p164_p13 }
  0x21   : > { %p193_p5 = scmp.lt.s32.totalorder (!%p165_p4), %s1850_s19, 1  ;;  %s1587_s24 = smul.u32 (!%p165_p4), 96, %s1846_s18 }
  0x22   : > { %168 = sbr.rel (%p165_p4) target bundleno = 384 (0x180), region = 28  ;;  %s2390_s0 = sld [smem:[#allocation10_spill]] (!%p165_p4) }
  0x23   : > { %s183_s26 = sand.u32 (!%p165_p4), 1, %s1838_s16   ;;  %s1608_s10 = sshll.u32 (!%p165_p4), %s1846_s18, 4 }
  0x24   : > { %s1411_s9 = sshll.u32 (!%p165_p4), %s183_s26, 7  ;;  %s1581_s11 = sshll.u32 (!%p165_p4), %s1850_s19, 5 }
  0x25   : > { %s2199_s4 = scalar_lea.vmem (!%p165_p4), [#allocation2], %s1411_s9  ;;  %s1732_s7 = scalar_lea.hbm (!%p165_p4), %s2375_s2, 512 }
  0x27   : > { %v1606_v0 = vld [vmem:[%s2374_s1 + $0x10] sm:$0xff]  ;;  %v1596_v1 = vld [vmem:[%s2374_s1] sm:$0xff]  ;;  %v1597_v2 = vld [vmem:[%s2374_s1 + $0x8] sm:$0xff]  ;;  %s194_s23 = scalar_select %p193_p5, %s1850_s19, 1  ;;  %vm460_vm0 = vcmask 130048  }
  0x28   : > { %v1607_v3 = vld [vmem:[%s2374_s1 + $0x18] sm:$0xff]  ;;  %753 = vmatpush.bf16.msra.mxu2 %v1606_v0  ;;  %611 = vmatpush.bf16.msra.mxu1 %v1596_v1  ;;  %vm232_vm1 = vsmask.f32 3328  ;;  %vm233_vm2 = vsmask.f32 7440 }
  0x29   : > { %492 = vmatpush.bf16.msra.mxu0 %v1597_v2  ;;  %1091 = vmatpush.bf16.msra.mxu3 %v1607_v3  ;;  %s1609_s27 = smul.u32 204, %s194_s23  ;;  %vm2041_vm3 = vmor %vm232_vm1, %vm233_vm2  ;;  %s1265_s23 = sadd.s32 %s1608_s10, %s1581_s11 }
  0x2a   : > { %s1248_s10 = scalar_lea.sflag [#allocation3], %s183_s26 }
  0x2b   : > { %s197_s28 = scalar_lea.vmem %s2390_s0, %s1609_s27 }
  0x2c   : > { %s2026_s8 = scalar_lea.vmem %s197_s28, %s1587_s24  ;;  %s1582_s24 = sshll.u32 %s1265_s23, 3 }
  0x2d   : > { %v1598_v4 = vld [vmem:[%s2026_s8 + $0xc] sm:$0xff]  ;;  %v1588_v5 = vld [vmem:[%s2026_s8] sm:$0xff]  ;;  %v224_v8 = vld [vmem:[%s2026_s8 + $0x8] sm:$0x1]  ;;  %s1267_s28 = scalar_lea.hbm %s2375_s2, %s1582_s24 }
  0x2e   : > { %v206_v6 = vld [vmem:[%s2026_s8] sm:$0xf]  ;;  %v207_v7 = vld [vmem:[%s2026_s8 + $0x4] sm:$0xf]  ;;  %1531 = vmatmul.msk.bf16.vlgmr.msra.gmra.mxu2 %vm460_vm0, %v1598_v4  ;;  %1467 = vmatmul.msk.bf16.vlgmr.msra.gmra.mxu1 %vm460_vm0, %v1588_v5  ;;  %v255_v13 = vshll.u32 %v224_v8, 16  ;;  %v1599_v2 = vld [vmem:[%s2026_s8 + $0x18] sm:$0xff] }
  0x2f   : > { %v236_v9 = vshrl.u32 %v206_v6, 16  ;;  %v239_v10 = vshll.u32 %v206_v6, 16  ;;  %v245_v11 = vshll.u32 %v207_v7, 16  ;;  %v249_v12 = vshrl.u32 %v207_v7, 16  ;;  %v1539_v14 = vld [vmem:[%s2026_s8 + $0xc] sm:$0xf] }
  0x30   : > { %v1540_v17 = vld [vmem:[%s2026_s8 + $0x10] sm:$0xf]  ;;  %v1541_v18 = vld [vmem:[%s2026_s8 + $0x14] sm:$0x1]  ;;  %v836_v21 = vshrl.u32 %v1539_v14, 16  ;;  %v839_v23 = vshll.u32 %v1539_v14, 16 }
  0x31   : > { %v238_v15 = vrot.slane %v236_v9, 4  ;;  %v241_v16 = vrot.slane %v239_v10, 5  ;;  %v247_v19 = vrot.slane %v245_v11, 5  ;;  %v251_v20 = vrot.slane %v249_v12, 4  ;;  %v208_v26 = vld [vmem:[%s2026_s8 + $0xc] sm:$0xf] }
  0x32   : > { %v845_v24 = vshll.u32 %v1540_v17, 16  ;;  %v849_v25 = vshrl.u32 %v1540_v17, 16  ;;  %v257_v29 = vrot.slane %v255_v13, 5  ;;  %v838_v30 = vrot.slane %v836_v21, 4  ;;  %v209_v32 = vld [vmem:[%s2026_s8 + $0x10] sm:$0xf] }
  0x33   : > { %v242_v22 = vor.u32 %v241_v16, %v238_v15  ;;  %v252_v28 = vor.u32 %v251_v20, %v247_v19  ;;  %v855_v31 = vshll.u32 %v1541_v18, 16  ;;  %v841_v34 = vrot.slane %v839_v23, 5  ;;  %v225_v44 = vld [vmem:[%s2026_s8 + $0x14] sm:$0x1]  ;;  %v1542_v46 = vld [vmem:[%s2026_s8 + $0x18] sm:$0xf] }
  0x34   : > { %v847_v35 = vrot.slane %v845_v24, 5  ;;  %v851_v36 = vrot.slane %v849_v25, 4  ;;  %v260_v39 = vshrl.u32 %v208_v26, 16  ;;  %v263_v40 = vshll.u32 %v208_v26, 16  ;;  %v1543_v58 = vld [vmem:[%s2026_s8 + $0x1c] sm:$0xf] }
  0x35   : > { %v243_v33 = vrot.slane %v242_v22, 4  ;;  %v253_v37 = vrot.slane %v252_v28, 4  ;;  %v857_v38 = vrot.slane %v855_v31, 5  ;;  %v842_v42 = vor.u32 %v841_v34, %v838_v30  ;;  %v1589_v3 = vld [vmem:[%s2026_s8 + $0xc] sm:$0xff]  ;;  %v1544_v5 = vld [vmem:[%s2026_s8 + $0x20] sm:$0x1] }
  0x36   : > { %v852_v43 = vor.u32 %v851_v36, %v847_v35  ;;  %v269_v45 = vshll.u32 %v209_v32, 16  ;;  %v262_v49 = vrot.slane %v260_v39, 4  ;;  %v265_v50 = vrot.slane %v263_v40, 5  ;;  %v210_v10 = vld [vmem:[%s2026_s8 + $0x18] sm:$0xf]  ;;  %s1270_s9 = sshll.u32 %s1267_s28, 4  ;;  %s1271_s9 = int_to_ptr.hbm [resolvable:$true] %s1270_s9 }
  0x37   : > { %v248_v41 = vsel %vm2041_vm3, %v243_v33, %v247_v19  ;;  %v258_v47 = vsel %vm2041_vm3, %v253_v37, %v257_v29  ;;  %v843_v52 = vrot.slane %v842_v42, 4  ;;  %v273_v56 = vshrl.u32 %v209_v32, 16  ;;  %v211_v15 = vld [vmem:[%s2026_s8 + $0x1c] sm:$0xf]  ;;  %v1545_v31 = vld [vmem:[%s2026_s8 + $0x24] sm:$0xf] }
  0x38   : > { %v430_v48 = vunpack.c.l.b16 %v248_v41  ;;  %v431_v51 = vunpack.c.l.b16 %v258_v47  ;;  %v853_v53 = vrot.slane %v852_v43, 4  ;;  %v271_v54 = vrot.slane %v269_v45, 5  ;;  %v1546_v34 = vld [vmem:[%s2026_s8 + $0x28] sm:$0xf]  ;;  %v226_v41 = vld [vmem:[%s2026_s8 + $0x20] sm:$0x1] }
  0x39   : > { %v266_v55 = vor.u32 %v265_v50, %v262_v49  ;;  %v279_v57 = vshll.u32 %v225_v44, 16  ;;  %v860_v59 = vshrl.u32 %v1542_v46, 16  ;;  %v848_v61 = vsel %vm2041_vm3, %v843_v52, %v847_v35  ;;  %s1726_s11 = sshra.s32 %s1271_s9, 4  ;;  %s1727_s11 = int_to_ptr.hbm [resolvable:$true] %s1726_s11 }
  0x3a   : > { %v446_v60 = vpack.c.b16 %v431_v51, %v430_v48  ;;  %v858_v62 = vsel %vm2041_vm3, %v853_v53, %v857_v38  ;;  %v863_v63 = vshll.u32 %v1542_v46, 16  ;;  %v1030_v0 = vunpack.c.l.b16 %v848_v61  ;;  %s1728_s23 = scalar_lea.hbm %s1727_s11, 128  ;;  %p1733_p9 = scmp.lt.s32.totalorder %s1727_s11, %s2375_s2 }
  0x3b   : > { %v1031_v1 = vunpack.c.l.b16 %v858_v62  ;;  %v275_v4 = vrot.slane %v273_v56, 4  ;;  %v267_v6 = vrot.slane %v266_v55, 4  ;;  %v862_v7 = vrot.slane %v860_v59, 4  ;;  %v1547_v56 = vld [vmem:[%s2026_s8 + $0x2c] sm:$0x1]  ;;  %p1729_p2 = scmp.ne.s32.totalorder %s1727_s11, %s1728_s23  ;;  %p1734_p10 = scmp.lt.s32.totalorder %s1732_s7, %s1728_s23 }
  0x3c   : > { %1423 = vmatmul.msk.bf16.vlgmr.msra.gmra.mxu0 %vm460_vm0, %v446_v60  ;;  %v865_v8 = vrot.slane %v863_v63, 5  ;;  %v869_v9 = vshll.u32 %v1543_v58, 16  ;;  %v281_v13 = vrot.slane %v279_v57, 5  ;;  %v873_v14 = vshrl.u32 %v1543_v58, 16  ;;  %v1600_v60 = vld [vmem:[%s2026_s8 + $0x24] sm:$0xff] }
  0x3d   : > { %v1046_v11 = vpack.c.b16 %v1031_v1, %v1030_v0  ;;  %v276_v12 = vor.u32 %v275_v4, %v271_v54  ;;  %v879_v18 = vshll.u32 %v1544_v5, 16  ;;  %v284_v21 = vshrl.u32 %v210_v10, 16  ;;  %v212_v0 = vld [vmem:[%s2026_s8 + $0x24] sm:$0xf]  ;;  %v1590_v1 = vld [vmem:[%s2026_s8 + $0x18] sm:$0xff]  ;;  %p1730_p6 = pnand %p1729_p2, %p1959_p3  ;;  %p1735_p11 = por %p1734_p10, %p1733_p9 }
  0x3e   : > { %v866_v16 = vor.u32 %v865_v8, %v862_v7  ;;  %v871_v17 = vrot.slane %v869_v9, 5  ;;  %1532 = vmatmul.msk.bf16.gmra.mxu2 %vm460_vm0, %v1599_v2  ;;  %v875_v20 = vrot.slane %v873_v14, 4  ;;  %v287_v22 = vshll.u32 %v210_v10, 16  ;;  %1468 = vmatmul.msk.bf16.gmra.mxu1 %vm460_vm0, %v1589_v3  ;;  %v213_v4 = vld [vmem:[%s2026_s8 + $0x28] sm:$0xf] }
  0x3f   : > { %1569 = vmatmul.msk.bf16.vlgmr.msra.gmra.mxu3 %vm460_vm0, %v1046_v11  ;;  %v277_v19 = vrot.slane %v276_v12, 4  ;;  %v293_v24 = vshll.u32 %v211_v15, 16  ;;  %v297_v25 = vshrl.u32 %v211_v15, 16  ;;  %v272_v26 = vsel %vm2041_vm3, %v267_v6, %v271_v54  ;;  %v1548_v14 = vld [vmem:[%s2026_s8 + $0x30] sm:$0xf]  ;;  %p1731_p8 = pneg %p1730_p6 }
  0x40   : > { %v867_v23 = vrot.slane %v866_v16, 4  ;;  %v876_v29 = vor.u32 %v875_v20, %v871_v17  ;;  %v881_v30 = vrot.slane %v879_v18, 5  ;;  %v286_v32 = vrot.slane %v284_v21, 4  ;;  %v1549_v15 = vld [vmem:[%s2026_s8 + $0x34] sm:$0xf] }
  0x41   : > { %v282_v28 = vsel %vm2041_vm3, %v277_v19, %v281_v13  ;;  %v289_v33 = vrot.slane %v287_v22, 5  ;;  %v295_v37 = vrot.slane %v293_v24, 5  ;;  %v299_v38 = vrot.slane %v297_v25, 4  ;;  %v227_v20 = vld [vmem:[%s2026_s8 + $0x2c] sm:$0x1]  ;;  %p1736_p12 = pnand %p1735_p11, %p1731_p8 }
  0x42   : > { %v872_v35 = vsel %vm2041_vm3, %v867_v23, %v871_v17  ;;  %v877_v36 = vrot.slane %v876_v29, 4  ;;  %v432_v39 = vunpack.c.l.b16 %v272_v26  ;;  %v433_v40 = vunpack.c.l.b16 %v282_v28 }
  0x43   : > { %v884_v42 = vshrl.u32 %v1545_v31, 16  ;;  %v887_v43 = vshll.u32 %v1545_v31, 16  ;;  %v893_v45 = vshll.u32 %v1546_v34, 16  ;;  %v1032_v46 = vunpack.c.l.b16 %v872_v35 }
  0x44   : > { %v882_v44 = vsel %vm2041_vm3, %v877_v36, %v881_v30  ;;  %v290_v47 = vor.u32 %v289_v33, %v286_v32  ;;  %v300_v51 = vor.u32 %v299_v38, %v295_v37  ;;  %v303_v52 = vshll.u32 %v226_v41, 16  ;;  %v1550_v38 = vld [vmem:[%s2026_s8 + $0x38] sm:$0x1] }
  0x45   : > { %v886_v48 = vrot.slane %v884_v42, 4  ;;  %v889_v49 = vrot.slane %v887_v43, 5  ;;  %v1033_v50 = vunpack.c.l.b16 %v882_v44  ;;  %v897_v53 = vshrl.u32 %v1546_v34, 16  ;;  %v1601_v42 = vld [vmem:[%s2026_s8 + $0x30] sm:$0xff] }
  0x46   : > { %v447_v54 = vpack.c.b16 %v433_v40, %v432_v39  ;;  %v895_v55 = vrot.slane %v893_v45, 5  ;;  %v291_v61 = vrot.slane %v290_v47, 4  ;;  %v301_v62 = vrot.slane %v300_v51, 4  ;;  %v1591_v45 = vld [vmem:[%s2026_s8 + $0x24] sm:$0xff]  ;;  %v215_v51 = vld [vmem:[%s2026_s8 + $0x34] sm:$0xf] }
  0x47   : > { %v899_v57 = vrot.slane %v897_v53, 4  ;;  %v890_v58 = vor.u32 %v889_v49, %v886_v48  ;;  %v1047_v59 = vpack.c.b16 %v1033_v50, %v1032_v46  ;;  %v305_v63 = vrot.slane %v303_v52, 5  ;;  %v214_v50 = vld [vmem:[%s2026_s8 + $0x30] sm:$0xf]  ;;  %v1551_v52 = vld [vmem:[%s2026_s8 + $0x3c] sm:$0xf] }
  0x48   : > { %v903_v3 = vshll.u32 %v1547_v56, 16  ;;  %v308_v6 = vshrl.u32 %v212_v0, 16  ;;  %v296_v7 = vsel %vm2041_vm3, %v291_v61, %v295_v37  ;;  %v311_v9 = vshll.u32 %v212_v0, 16 }
  0x49   : > { %v900_v2 = vor.u32 %v899_v57, %v895_v55  ;;  %v891_v5 = vrot.slane %v890_v58, 4  ;;  %v306_v8 = vsel %vm2041_vm3, %v301_v62, %v305_v63  ;;  %v317_v10 = vshll.u32 %v213_v4, 16  ;;  %v1552_v62 = vld [vmem:[%s2026_s8 + $0x40] sm:$0xf] }
  0x4a   : > { %v905_v12 = vrot.slane %v903_v3, 5  ;;  %v321_v13 = vshrl.u32 %v213_v4, 16  ;;  %v434_v16 = vunpack.c.l.b16 %v296_v7  ;;  %v435_v17 = vunpack.c.l.b16 %v306_v8 }
  0x4b   : > { %v901_v11 = vrot.slane %v900_v2, 4  ;;  %v896_v18 = vsel %vm2041_vm3, %v891_v5, %v895_v55  ;;  %v310_v19 = vrot.slane %v308_v6, 4  ;;  %v313_v21 = vrot.slane %v311_v9, 5 }
  0x4c   : > { %1424 = vmatmul.msk.bf16.gmra.mxu0 %vm460_vm0, %v447_v54  ;;  %v319_v22 = vrot.slane %v317_v10, 5  ;;  %v908_v23 = vshrl.u32 %v1548_v14, 16  ;;  %v911_v24 = vshll.u32 %v1548_v14, 16  ;;  %v323_v26 = vrot.slane %v321_v13, 4  ;;  %v228_v13 = vld [vmem:[%s2026_s8 + $0x38] sm:$0x1] }
  0x4d   : > { %v906_v25 = vsel %vm2041_vm3, %v901_v11, %v905_v12  ;;  %v917_v28 = vshll.u32 %v1549_v15, 16  ;;  %v921_v29 = vshrl.u32 %v1549_v15, 16  ;;  %v448_v30 = vpack.c.b16 %v435_v17, %v434_v16 }
  0x4e   : > { %1533 = vmatmul.msk.bf16.gmra.mxu2 %vm460_vm0, %v1600_v60  ;;  %1469 = vmatmul.msk.bf16.gmra.mxu1 %vm460_vm0, %v1590_v1  ;;  %v327_v31 = vshll.u32 %v227_v20, 16  ;;  %v1034_v32 = vunpack.c.l.b16 %v896_v18  ;;  %v1035_v33 = vunpack.c.l.b16 %v906_v25  ;;  %v910_v34 = vrot.slane %v908_v23, 4  ;;  %v1602_v25 = vld [vmem:[%s2026_s8 + $0x3c] sm:$0xff] }
  0x4f   : > { %1570 = vmatmul.msk.bf16.gmra.mxu3 %vm460_vm0, %v1047_v59  ;;  %v913_v35 = vrot.slane %v911_v24, 5  ;;  %v314_v36 = vor.u32 %v313_v21, %v310_v19  ;;  %v324_v37 = vor.u32 %v323_v26, %v319_v22  ;;  %v919_v39 = vrot.slane %v917_v28, 5  ;;  %v216_v26 = vld [vmem:[%s2026_s8 + $0x3c] sm:$0xf]  ;;  %v1592_v28 = vld [vmem:[%s2026_s8 + $0x30] sm:$0xff] }
  0x50   : > { %v923_v40 = vrot.slane %v921_v29, 4  ;;  %v1048_v41 = vpack.c.b16 %v1035_v33, %v1034_v32  ;;  %v927_v44 = vshll.u32 %v1550_v38, 16  ;;  %v329_v48 = vrot.slane %v327_v31, 5  ;;  %v217_v31 = vld [vmem:[%s2026_s8 + $0x40] sm:$0xf] }
  0x51   : > { %v914_v43 = vor.u32 %v913_v35, %v910_v34  ;;  %v315_v46 = vrot.slane %v314_v36, 4  ;;  %v325_v47 = vrot.slane %v324_v37, 4  ;;  %v332_v55 = vshrl.u32 %v214_v50, 16 }
  0x52   : > { %v924_v49 = vor.u32 %v923_v40, %v919_v39  ;;  %v929_v54 = vrot.slane %v927_v44, 5  ;;  %v335_v59 = vshll.u32 %v214_v50, 16  ;;  %v341_v60 = vshll.u32 %v215_v51, 16  ;;  %v1554_v40 = vld [vmem:[%s2026_s8 + $0x48] sm:$0xf] }
  0x53   : > { %v915_v53 = vrot.slane %v914_v43, 4  ;;  %v320_v56 = vsel %vm2041_vm3, %v315_v46, %v319_v22  ;;  %v330_v57 = vsel %vm2041_vm3, %v325_v47, %v329_v48  ;;  %v345_v61 = vshrl.u32 %v215_v51, 16  ;;  %v1553_v22 = vld [vmem:[%s2026_s8 + $0x44] sm:$0x1] }
  0x54   : > { %v925_v58 = vrot.slane %v924_v49, 4  ;;  %v932_v63 = vshrl.u32 %v1551_v52, 16  ;;  %v935_v0 = vshll.u32 %v1551_v52, 16  ;;  %v436_v1 = vunpack.c.l.b16 %v320_v56 }
  0x55   : > { %v437_v2 = vunpack.c.l.b16 %v330_v57  ;;  %v920_v3 = vsel %vm2041_vm3, %v915_v53, %v919_v39  ;;  %v334_v4 = vrot.slane %v332_v55, 4  ;;  %v337_v6 = vrot.slane %v335_v59, 5 }
  0x56   : > { %v930_v5 = vsel %vm2041_vm3, %v925_v58, %v929_v54  ;;  %v941_v7 = vshll.u32 %v1552_v62, 16  ;;  %v945_v8 = vshrl.u32 %v1552_v62, 16  ;;  %v343_v9 = vrot.slane %v341_v60, 5  ;;  %v229_v58 = vld [vmem:[%s2026_s8 + $0x44] sm:$0x1] }
  0x57   : > { %v347_v10 = vrot.slane %v345_v61, 4  ;;  %v934_v11 = vrot.slane %v932_v63, 4  ;;  %v937_v12 = vrot.slane %v935_v0, 5  ;;  %v1036_v14 = vunpack.c.l.b16 %v920_v3 }
  0x58   : > { %v1037_v15 = vunpack.c.l.b16 %v930_v5  ;;  %v449_v16 = vpack.c.b16 %v437_v2, %v436_v1  ;;  %v943_v17 = vrot.slane %v941_v7, 5  ;;  %v947_v18 = vrot.slane %v945_v8, 4 }
  0x59   : > { %v338_v19 = vor.u32 %v337_v6, %v334_v4  ;;  %v348_v20 = vor.u32 %v347_v10, %v343_v9  ;;  %v351_v21 = vshll.u32 %v228_v13, 16  ;;  %v938_v23 = vor.u32 %v937_v12, %v934_v11  ;;  %v1556_v4 = vld [vmem:[%s2026_s8 + $0x50] sm:$0x1]  ;;  %v1603_v10 = vld [vmem:[%s2026_s8 + $0x48] sm:$0xff] }
  0x5a   : > { %v1049_v24 = vpack.c.b16 %v1037_v15, %v1036_v14  ;;  %v948_v29 = vor.u32 %v947_v18, %v943_v17  ;;  %v356_v36 = vshrl.u32 %v216_v26, 16  ;;  %v359_v37 = vshll.u32 %v216_v26, 16  ;;  %v1593_v14 = vld [vmem:[%s2026_s8 + $0x3c] sm:$0xff]  ;;  %v218_v15 = vld [vmem:[%s2026_s8 + $0x48] sm:$0xf] }
  0x5b   : > { %v339_v32 = vrot.slane %v338_v19, 4  ;;  %v349_v33 = vrot.slane %v348_v20, 4  ;;  %v353_v34 = vrot.slane %v351_v21, 5  ;;  %v939_v35 = vrot.slane %v938_v23, 4  ;;  %v1557_v26 = vld [vmem:[%s2026_s8 + $0x54] sm:$0xf] }
  0x5c   : > { %1425 = vmatmul.msk.bf16.gmra.mxu0 %vm460_vm0, %v448_v30  ;;  %v951_v30 = vshll.u32 %v1553_v22, 16  ;;  %v365_v38 = vshll.u32 %v217_v31, 16  ;;  %v369_v39 = vshrl.u32 %v217_v31, 16  ;;  %v956_v47 = vshrl.u32 %v1554_v40, 16 }
  0x5d   : > { %v344_v44 = vsel %vm2041_vm3, %v339_v32, %v343_v9  ;;  %v944_v46 = vsel %vm2041_vm3, %v939_v35, %v943_v17  ;;  %v959_v48 = vshll.u32 %v1554_v40, 16  ;;  %v358_v51 = vrot.slane %v356_v36, 4 }
  0x5e   : > { %1534 = vmatmul.msk.bf16.gmra.mxu2 %vm460_vm0, %v1601_v42  ;;  %1470 = vmatmul.msk.bf16.gmra.mxu1 %vm460_vm0, %v1591_v45  ;;  %v949_v42 = vrot.slane %v948_v29, 4  ;;  %v953_v43 = vrot.slane %v951_v30, 5  ;;  %v354_v45 = vsel %vm2041_vm3, %v349_v33, %v353_v34  ;;  %v361_v52 = vrot.slane %v359_v37, 5 }
  0x5f   : > { %1571 = vmatmul.msk.bf16.gmra.mxu3 %vm460_vm0, %v1048_v41  ;;  %v1555_v41 = vld [vmem:[%s2026_s8 + $0x4c] sm:$0xf]  ;;  %v367_v53 = vrot.slane %v365_v38, 5  ;;  %v371_v54 = vrot.slane %v369_v39, 4  ;;  %v438_v55 = vunpack.c.l.b16 %v344_v44  ;;  %v439_v56 = vunpack.c.l.b16 %v354_v45 }
  0x60   : > { %v965_v49 = vshll.u32 %v1555_v41, 16  ;;  %v969_v50 = vshrl.u32 %v1555_v41, 16  ;;  %v954_v57 = vsel %vm2041_vm3, %v949_v42, %v953_v43  ;;  %v1038_v59 = vunpack.c.l.b16 %v944_v46  ;;  %v230_v41 = vld [vmem:[%s2026_s8 + $0x50] sm:$0x1] }
  0x61   : > { %v958_v60 = vrot.slane %v956_v47, 4  ;;  %v961_v61 = vrot.slane %v959_v48, 5  ;;  %v1039_v0 = vunpack.c.l.b16 %v954_v57  ;;  %v362_v1 = vor.u32 %v361_v52, %v358_v51  ;;  %v1559_v52 = vld [vmem:[%s2026_s8 + $0x5c] sm:$0x1] }
  0x62   : > { %v967_v62 = vrot.slane %v965_v49, 5  ;;  %v971_v63 = vrot.slane %v969_v50, 4  ;;  %v372_v2 = vor.u32 %v371_v54, %v367_v53  ;;  %v375_v3 = vshll.u32 %v229_v58, 16  ;;  %v1604_v54 = vld [vmem:[%s2026_s8 + $0x54] sm:$0xff]  ;;  %v1594_v58 = vld [vmem:[%s2026_s8 + $0x48] sm:$0xff] }
  0x63   : > { %v450_v5 = vpack.c.b16 %v439_v56, %v438_v55  ;;  %v962_v6 = vor.u32 %v961_v61, %v958_v60  ;;  %v975_v8 = vshll.u32 %v1556_v4, 16  ;;  %v1050_v9 = vpack.c.b16 %v1039_v0, %v1038_v59 }
  0x64   : > { %v972_v7 = vor.u32 %v971_v63, %v967_v62  ;;  %v363_v11 = vrot.slane %v362_v1, 4  ;;  %v373_v12 = vrot.slane %v372_v2, 4  ;;  %v377_v13 = vrot.slane %v375_v3, 5  ;;  %v221_v63 = vld [vmem:[%s2026_s8 + $0x58] sm:$0xf] }
  0x65   : > { %v963_v17 = vrot.slane %v962_v6, 4  ;;  %v977_v19 = vrot.slane %v975_v8, 5  ;;  %v380_v22 = vshrl.u32 %v218_v15, 16  ;;  %v383_v23 = vshll.u32 %v218_v15, 16 }
  0x66   : > { %v973_v18 = vrot.slane %v972_v7, 4  ;;  %v368_v20 = vsel %vm2041_vm3, %v363_v11, %v367_v53  ;;  %v378_v21 = vsel %vm2041_vm3, %v373_v12, %v377_v13  ;;  %v980_v33 = vshrl.u32 %v1557_v26, 16 }
  0x67   : > { %v440_v29 = vunpack.c.l.b16 %v368_v20  ;;  %v441_v30 = vunpack.c.l.b16 %v378_v21  ;;  %v968_v31 = vsel %vm2041_vm3, %v963_v17, %v967_v62  ;;  %v983_v34 = vshll.u32 %v1557_v26, 16  ;;  %v220_v62 = vld [vmem:[%s2026_s8 + $0x54] sm:$0xf] }
  0x68   : > { %v978_v32 = vsel %vm2041_vm3, %v973_v18, %v977_v19  ;;  %v382_v37 = vrot.slane %v380_v22, 4  ;;  %v385_v38 = vrot.slane %v383_v23, 5  ;;  %v1040_v42 = vunpack.c.l.b16 %v968_v31  ;;  %v231_v23 = vld [vmem:[%s2026_s8 + $0x5c] sm:$0x1] }
  0x69   : > { %v1041_v43 = vunpack.c.l.b16 %v978_v32  ;;  %v982_v44 = vrot.slane %v980_v33, 4  ;;  %v985_v45 = vrot.slane %v983_v34, 5  ;;  %v451_v48 = vpack.c.b16 %v441_v30, %v440_v29 }
  0x6a   : > { %v386_v49 = vor.u32 %v385_v38, %v382_v37  ;;  %v399_v51 = vshll.u32 %v230_v41, 16  ;;  %v999_v57 = vshll.u32 %v1559_v52, 16  ;;  %v407_v6 = vshll.u32 %v220_v62, 16  ;;  %v1605_v37 = vld [vmem:[%s2026_s8 + $0x60] sm:$0xff]  ;;  %v1595_v38 = vld [vmem:[%s2026_s8 + $0x54] sm:$0xff] }
  0x6b   : > { %v1051_v53 = vpack.c.b16 %v1041_v43, %v1040_v42  ;;  %v986_v55 = vor.u32 %v985_v45, %v982_v44  ;;  %v413_v7 = vshll.u32 %v221_v63, 16  ;;  %v417_v8 = vshrl.u32 %v221_v63, 16 }
  0x6c   : > { %1426 = vmatmul.msk.bf16.gmra.mxu0 %vm460_vm0, %v449_v16  ;;  %v219_v16 = vld [vmem:[%s2026_s8 + $0x4c] sm:$0xf]  ;;  %v387_v59 = vrot.slane %v386_v49, 4  ;;  %v401_v61 = vrot.slane %v399_v51, 5  ;;  %v1001_v2 = vrot.slane %v999_v57, 5  ;;  %v409_v20 = vrot.slane %v407_v6, 5 }
  0x6d   : > { %v987_v0 = vrot.slane %v986_v55, 4  ;;  %v415_v21 = vrot.slane %v413_v7, 5  ;;  %v419_v22 = vrot.slane %v417_v8, 4  ;;  %v423_v34 = vshll.u32 %v231_v23, 16 }
  0x6e   : > { %1535 = vmatmul.msk.bf16.gmra.mxu2 %vm460_vm0, %v1602_v25  ;;  %1471 = vmatmul.msk.bf16.gmra.mxu1 %vm460_vm0, %v1592_v28  ;;  %v393_v25 = vshrl.u32 %v219_v16, 16  ;;  %v1558_v28 = vld [vmem:[%s2026_s8 + $0x58] sm:$0xf] }
  0x6f   : > { %1572 = vmatmul.msk.bf16.gmra.mxu3 %vm460_vm0, %v1049_v24  ;;  %v389_v24 = vshll.u32 %v219_v16, 16  ;;  %v989_v35 = vshll.u32 %v1558_v28, 16  ;;  %v993_v36 = vshrl.u32 %v1558_v28, 16  ;;  %v420_v33 = vor.u32 %v419_v22, %v415_v21 }
  0x70   : > { %v395_v40 = vrot.slane %v393_v25, 4  ;;  %v425_v44 = vrot.slane %v423_v34, 5 }
  0x71   : > { %v391_v39 = vrot.slane %v389_v24, 5  ;;  %v991_v46 = vrot.slane %v989_v35, 5  ;;  %v995_v47 = vrot.slane %v993_v36, 4  ;;  %v1562_v35 = vld [vmem:[%s2026_s8 + $0x68] sm:$0x1]  ;;  %v421_v43 = vrot.slane %v420_v33, 4 }
  0x72   : > { %v1023_v41 = vshll.u32 %v1562_v35, 16 }
  0x73   : > { %v396_v50 = vor.u32 %v395_v40, %v391_v39  ;;  %v996_v56 = vor.u32 %v995_v47, %v991_v46  ;;  %v392_v3 = vsel %vm2041_vm3, %v387_v59, %v391_v39  ;;  %v992_v13 = vsel %vm2041_vm3, %v987_v0, %v991_v46 }
  0x74   : > { %v442_v11 = vunpack.c.l.b16 %v392_v3  ;;  %v1042_v25 = vunpack.c.l.b16 %v992_v13  ;;  %v1025_v47 = vrot.slane %v1023_v41, 5  ;;  %v426_v49 = vsel %vm2041_vm3, %v421_v43, %v425_v44 }
  0x75   : > { %v397_v60 = vrot.slane %v396_v50, 4  ;;  %v997_v1 = vrot.slane %v996_v56, 4  ;;  %v445_v51 = vunpack.c.l.b16 %v426_v49 }
  0x77   : > { %v402_v4 = vsel %vm2041_vm3, %v397_v60, %v401_v61 }
  0x78   : > { %v443_v12 = vunpack.c.l.b16 %v402_v4 }
  0x7a   : > { %v452_v24 = vpack.c.b16 %v443_v12, %v442_v11 }
  0x7c   : > { %1427 = vmatmul.msk.bf16.gmra.mxu0 %vm460_vm0, %v450_v5  ;;  %v404_v5 = vshrl.u32 %v220_v62, 16 }
  0x7e   : > { %1536 = vmatmul.msk.bf16.gmra.mxu2 %vm460_vm0, %v1603_v10  ;;  %1472 = vmatmul.msk.bf16.gmra.mxu1 %vm460_vm0, %v1593_v14  ;;  %v1561_v10 = vld [vmem:[%s2026_s8 + $0x64] sm:$0xf]  ;;  %v1002_v14 = vsel %vm2041_vm3, %v997_v1, %v1001_v2  ;;  %v406_v19 = vrot.slane %v404_v5, 4 }
  0x7f   : > { %1573 = vmatmul.msk.bf16.gmra.mxu3 %vm460_vm0, %v1050_v9  ;;  %v1560_v9 = vld [vmem:[%s2026_s8 + $0x60] sm:$0xf]  ;;  %v1013_v17 = vshll.u32 %v1561_v10, 16  ;;  %v1017_v18 = vshrl.u32 %v1561_v10, 16  ;;  %v1043_v26 = vunpack.c.l.b16 %v1002_v14  ;;  %s1268_s8 = sshll.u32 %s2199_s4, 4  ;;  %s1269_s8 = int_to_ptr.vmem [resolvable:$true] %s1268_s8 }
  0x80   : > { %v1004_v15 = vshrl.u32 %v1560_v9, 16  ;;  %v1007_v16 = vshll.u32 %v1560_v9, 16  ;;  %v410_v32 = vor.u32 %v409_v20, %v406_v19 }
  0x81   : > { %v1015_v30 = vrot.slane %v1013_v17, 5  ;;  %v1019_v31 = vrot.slane %v1017_v18, 4  ;;  %v1052_v36 = vpack.c.b16 %v1043_v26, %v1042_v25 }
  0x82   : > { %v1006_v28 = vrot.slane %v1004_v15, 4  ;;  %v1009_v29 = vrot.slane %v1007_v16, 5  ;;  %v411_v42 = vrot.slane %v410_v32, 4 }
  0x83   : > { %v1020_v40 = vor.u32 %v1019_v31, %v1015_v30 }
  0x84   : > { %v1010_v39 = vor.u32 %v1009_v29, %v1006_v28 }
  0x85   : > { %v1021_v46 = vrot.slane %v1020_v40, 4 }
  0x86   : > { %v1011_v45 = vrot.slane %v1010_v39, 4 }
  0x88   : > { %v1016_v52 = vsel %vm2041_vm3, %v1011_v45, %v1015_v30 }
  0x8c   : > { %1428 = vmatmul.msk.bf16.gmra.mxu0 %vm460_vm0, %v451_v48  ;;  %v416_v48 = vsel %vm2041_vm3, %v411_v42, %v415_v21 }
  0x8d   : > { %v444_v50 = vunpack.c.l.b16 %v416_v48 }
  0x8e   : > { %1537 = vmatmul.msk.bf16.gmra.mxu2 %vm460_vm0, %v1604_v54  ;;  %1473 = vmatmul.msk.bf16.gmra.mxu1 %vm460_vm0, %v1594_v58  ;;  %v1044_v54 = vunpack.c.l.b16 %v1016_v52 }
  0x8f   : > { %1574 = vmatmul.msk.bf16.gmra.mxu3 %vm460_vm0, %v1051_v53  ;;  %v1026_v53 = vsel %vm2041_vm3, %v1021_v46, %v1025_v47  ;;  %v453_v56 = vpack.c.b16 %v445_v51, %v444_v50 }
  0x90   : > { %v1045_v55 = vunpack.c.l.b16 %v1026_v53 }
  0x92   : > { %v1053_v57 = vpack.c.b16 %v1045_v55, %v1044_v54 }
  0x9c   : > { %1429 = vmatmul.msk.bf16.gmra.mxu0 %vm460_vm0, %v452_v24 }
  0x9e   : > { %1538 = vmatmul.msk.bf16.gmra.mxu2 %vm460_vm0, %v1605_v37  ;;  %1474 = vmatmul.msk.bf16.gmra.mxu1 %vm460_vm0, %v1595_v38 }
  0x9f   : > { %1575 = vmatmul.msk.bf16.gmra.mxu3 %vm460_vm0, %v1052_v36 }
  0xab   : > { %v613_v58 = vpop.f32.mrf.mxu1 }
  0xac   : > { %1430 = vmatmul.msk.bf16.gmra.mxu0 %vm460_vm0, %v453_v56 }
  0xaf   : > { %1576 = vmatmul.msk.bf16.gmra.mxu3 %vm460_vm0, %v1053_v57 }
  0xb1   : > { %v755_v59 = vpop.f32.mrf.mxu2 }
  0xb3   : > { %v615_v60 = vpop.f32.mrf.mxu1 }
  0xb9   : > { %v494_v61 = vpop.f32.mrf.mxu0  ;;  %v757_v62 = vpop.f32.mrf.mxu2 }
  0xba   : > { %v614_v63 = vadd.f32 %v613_v58, %v494_v61 }
  0xbb   : > { %v618_v0 = vpop.f32.mrf.mxu1 }
  0xbc   : > { %v795_v27 = vadd.f32 %v755_v59, %v614_v63 }
  0xc1   : > { %v496_v1 = vpop.f32.mrf.mxu0  ;;  %v760_v3 = vpop.f32.mrf.mxu2 }
  0xc2   : > { %v1093_v2 = vpop.f32.mrf.mxu3  ;;  %v616_v5 = vadd.f32 %v615_v60, %v496_v1 }
  0xc3   : > { %v2197_v4 = vadd.f32 %v1093_v2, %v795_v27  ;;  %v620_v6 = vpop.f32.mrf.mxu1 }
  0xc4   : > { %v796_v7 = vadd.f32 %v757_v62, %v616_v5 }
  0xc5   : > { %1149 = vst [vmem:[%s2199_s4] sm:$0xff] %v2197_v4 }
  0xc9   : > { %v499_v8 = vpop.f32.mrf.mxu0  ;;  %v762_v10 = vpop.f32.mrf.mxu2 }
  0xca   : > { %v1095_v9 = vpop.f32.mrf.mxu3  ;;  %v619_v12 = vadd.f32 %v618_v0, %v499_v8 }
  0xcb   : > { %v2203_v11 = vadd.f32 %v1095_v9, %v796_v7  ;;  %v623_v13 = vpop.f32.mrf.mxu1 }
  0xcc   : > { %v797_v14 = vadd.f32 %v760_v3, %v619_v12 }
  0xcd   : > { %1150 = vst [vmem:[%s2199_s4 + $0x8] sm:$0xff] %v2203_v11 }
  0xd1   : > { %v501_v15 = vpop.f32.mrf.mxu0  ;;  %v765_v17 = vpop.f32.mrf.mxu2 }
  0xd2   : > { %v1098_v16 = vpop.f32.mrf.mxu3  ;;  %v621_v19 = vadd.f32 %v620_v6, %v501_v15 }
  0xd3   : > { %v2207_v18 = vadd.f32 %v1098_v16, %v797_v14  ;;  %v625_v20 = vpop.f32.mrf.mxu1 }
  0xd4   : > { %v798_v21 = vadd.f32 %v762_v10, %v621_v19 }
  0xd5   : > { %1151 = vst [vmem:[%s2199_s4 + $0x10] sm:$0xff] %v2207_v18 }
  0xd9   : > { %v504_v22 = vpop.f32.mrf.mxu0  ;;  %v767_v24 = vpop.f32.mrf.mxu2 }
  0xda   : > { %v1100_v23 = vpop.f32.mrf.mxu3  ;;  %v624_v26 = vadd.f32 %v623_v13, %v504_v22  ;;  %v1165_v22 = vadd.f32 %v2203_v11, %v2197_v4 }
  0xdb   : > { %v2211_v25 = vadd.f32 %v1100_v23, %v798_v21  ;;  %v628_v28 = vpop.f32.mrf.mxu1 }
  0xdc   : > { %v799_v29 = vadd.f32 %v765_v17, %v624_v26  ;;  %v1166_v26 = vadd.f32 %v1165_v22, %v2207_v18 }
  0xdd   : > { %1152 = vst [vmem:[%s2199_s4 + $0x18] sm:$0xff] %v2211_v25 }
  0xe1   : > { %v506_v30 = vpop.f32.mrf.mxu0  ;;  %v770_v32 = vpop.f32.mrf.mxu2 }
  0xe2   : > { %v1103_v31 = vpop.f32.mrf.mxu3  ;;  %v626_v34 = vadd.f32 %v625_v20, %v506_v30  ;;  %v1167_v30 = vadd.f32 %v1166_v26, %v2211_v25 }
  0xe3   : > { %v2215_v33 = vadd.f32 %v1103_v31, %v799_v29  ;;  %v630_v35 = vpop.f32.mrf.mxu1 }
  0xe4   : > { %v800_v36 = vadd.f32 %v767_v24, %v626_v34 }
  0xe5   : > { %1153 = vst [vmem:[%s2199_s4 + $0x20] sm:$0xff] %v2215_v33 }
  0xe9   : > { %v509_v37 = vpop.f32.mrf.mxu0  ;;  %v772_v39 = vpop.f32.mrf.mxu2 }
  0xea   : > { %v1105_v38 = vpop.f32.mrf.mxu3  ;;  %v629_v41 = vadd.f32 %v628_v28, %v509_v37 }
  0xeb   : > { %v2219_v40 = vadd.f32 %v1105_v38, %v800_v36  ;;  %v633_v42 = vpop.f32.mrf.mxu1 }
  0xec   : > { %v801_v43 = vadd.f32 %v770_v32, %v629_v41  ;;  %v1168_v32 = vadd.f32 %v1167_v30, %v2215_v33 }
  0xed   : > { %1154 = vst [vmem:[%s2199_s4 + $0x28] sm:$0xff] %v2219_v40 }
  0xee   : > { %v1169_v34 = vadd.f32 %v1168_v32, %v2219_v40 }
  0xf1   : > { %v511_v44 = vpop.f32.mrf.mxu0  ;;  %v775_v46 = vpop.f32.mrf.mxu2 }
  0xf2   : > { %v1108_v45 = vpop.f32.mrf.mxu3  ;;  %v631_v48 = vadd.f32 %v630_v35, %v511_v44 }
  0xf3   : > { %v2223_v47 = vadd.f32 %v1108_v45, %v801_v43  ;;  %v635_v49 = vpop.f32.mrf.mxu1 }
  0xf4   : > { %v802_v50 = vadd.f32 %v772_v39, %v631_v48 }
  0xf5   : > { %1155 = vst [vmem:[%s2199_s4 + $0x30] sm:$0xff] %v2223_v47  ;;  %v1170_v39 = vadd.f32 %v1169_v34, %v2223_v47 }
  0xf9   : > { %v514_v51 = vpop.f32.mrf.mxu0  ;;  %v777_v55 = vpop.f32.mrf.mxu2 }
  0xfa   : > { %v1110_v52 = vpop.f32.mrf.mxu3  ;;  %v634_v54 = vadd.f32 %v633_v42, %v514_v51 }
  0xfb   : > { %v2227_v53 = vadd.f32 %v1110_v52, %v802_v50  ;;  %v638_v59 = vpop.f32.mrf.mxu1 }
  0xfc   : > { %v803_v56 = vadd.f32 %v775_v46, %v634_v54 }
  0xfd   : > { %1156 = vst [vmem:[%s2199_s4 + $0x38] sm:$0xff] %v2227_v53  ;;  %v1171_v43 = vadd.f32 %v1170_v39, %v2227_v53 }
 0x101   : > { %v516_v57 = vpop.f32.mrf.mxu0  ;;  %v780_v62 = vpop.f32.mrf.mxu2 }
 0x102   : > { %v1113_v58 = vpop.f32.mrf.mxu3  ;;  %v636_v61 = vadd.f32 %v635_v49, %v516_v57 }
 0x103   : > { %v2231_v60 = vadd.f32 %v1113_v58, %v803_v56  ;;  %v640_v3 = vpop.f32.mrf.mxu1 }
 0x104   : > { %v804_v63 = vadd.f32 %v777_v55, %v636_v61 }
 0x105   : > { %1157 = vst [vmem:[%s2199_s4 + $0x40] sm:$0xff] %v2231_v60  ;;  %v1172_v45 = vadd.f32 %v1171_v43, %v2231_v60 }
 0x109   : > { %v519_v0 = vpop.f32.mrf.mxu0  ;;  %v782_v6 = vpop.f32.mrf.mxu2 }
 0x10a   : > { %v1115_v27 = vpop.f32.mrf.mxu3  ;;  %v639_v2 = vadd.f32 %v638_v59, %v519_v0 }
 0x10b   : > { %v2235_v1 = vadd.f32 %v1115_v27, %v804_v63  ;;  %v643_v12 = vpop.f32.mrf.mxu1 }
 0x10c   : > { %v805_v5 = vadd.f32 %v780_v62, %v639_v2 }
 0x10d   : > { %1158 = vst [vmem:[%s2199_s4 + $0x48] sm:$0xff] %v2235_v1  ;;  %v1173_v48 = vadd.f32 %v1172_v45, %v2235_v1 }
 0x111   : > { %v521_v7 = vpop.f32.mrf.mxu0  ;;  %v785_v15 = vpop.f32.mrf.mxu2 }
 0x112   : > { %v1118_v8 = vpop.f32.mrf.mxu3  ;;  %v641_v10 = vadd.f32 %v640_v3, %v521_v7 }
 0x113   : > { %v2239_v9 = vadd.f32 %v1118_v8, %v805_v5  ;;  %v645_v21 = vpop.f32.mrf.mxu1 }
 0x114   : > { %v806_v13 = vadd.f32 %v782_v6, %v641_v10 }
 0x115   : > { %1159 = vst [vmem:[%s2199_s4 + $0x50] sm:$0xff] %v2239_v9  ;;  %v1174_v51 = vadd.f32 %v1173_v48, %v2239_v9 }
 0x119   : > { %v524_v14 = vpop.f32.mrf.mxu0  ;;  %v787_v29 = vpop.f32.mrf.mxu2 }
 0x11a   : > { %v1120_v16 = vpop.f32.mrf.mxu3  ;;  %v644_v19 = vadd.f32 %v643_v12, %v524_v14 }
 0x11b   : > { %v2243_v17 = vadd.f32 %v1120_v16, %v806_v13  ;;  %v648_v37 = vpop.f32.mrf.mxu1 }
 0x11c   : > { %v807_v20 = vadd.f32 %v785_v15, %v644_v19 }
 0x11d   : > { %1160 = vst [vmem:[%s2199_s4 + $0x58] sm:$0xff] %v2243_v17  ;;  %v1175_v55 = vadd.f32 %v1174_v51, %v2243_v17 }
 0x121   : > { %v526_v23 = vpop.f32.mrf.mxu0  ;;  %v790_v44 = vpop.f32.mrf.mxu2 }
 0x122   : > { %v1123_v24 = vpop.f32.mrf.mxu3  ;;  %v646_v31 = vadd.f32 %v645_v21, %v526_v23 }
 0x123   : > { %v2250_v28 = vadd.f32 %v1123_v24, %v807_v20  ;;  %v650_v54 = vpop.f32.mrf.mxu1 }
 0x124   : > { %v808_v35 = vadd.f32 %v787_v29, %v646_v31 }
 0x125   : > { %1161 = vst [vmem:[%s2199_s4 + $0x60] sm:$0xff] %v2250_v28  ;;  %v1176_v57 = vadd.f32 %v1175_v55, %v2250_v28 }
 0x129   : > { %v529_v36 = vpop.f32.mrf.mxu0  ;;  %v792_v58 = vpop.f32.mrf.mxu2 }
 0x12a   : > { %v1125_v38 = vpop.f32.mrf.mxu3  ;;  %v649_v42 = vadd.f32 %v648_v37, %v529_v36 }
 0x12b   : > { %v2258_v41 = vadd.f32 %v1125_v38, %v808_v35 }
 0x12c   : > { %v809_v46 = vadd.f32 %v790_v44, %v649_v42 }
 0x12d   : > { %1162 = vst [vmem:[%s2199_s4 + $0x68] sm:$0xff] %v2258_v41  ;;  %v1177_v59 = vadd.f32 %v1176_v57, %v2258_v41 }
 0x131   : > { %v531_v50 = vpop.f32.mrf.mxu0 }
 0x132   : > { %v1128_v49 = vpop.f32.mrf.mxu3  ;;  %v651_v56 = vadd.f32 %v650_v54, %v531_v50 }
 0x133   : > { %v2268_v52 = vadd.f32 %v1128_v49, %v809_v46 }
 0x134   : > { %v810_v61 = vadd.f32 %v792_v58, %v651_v56 }
 0x135   : > { %1163 = vst [vmem:[%s2199_s4 + $0x70] sm:$0xff] %v2268_v52  ;;  %v1178_v63 = vadd.f32 %v1177_v59, %v2268_v52 }
 0x13a   : > { %v1130_v62 = vpop.f32.mrf.mxu3 }
 0x13b   : > { %v2280_v0 = vadd.f32 %v1130_v62, %v810_v61 }
 0x13d   : > { %1164 = vst [vmem:[%s2199_s4 + $0x78] sm:$0xff] %v2280_v0  ;;  %v1179_v27 = vadd.f32 %v1178_v63, %v2280_v0 }
 0x13e   : > { %1739 = shalt.err (!%p1736_p12)
}
 0x13f   : > { %s1864_s26 = smov 128   ;;  %s1865_s4 = smov 8   ;;  %v1180_v2 = vrot.slane %v1179_v27, 4 }
 0x140   : > { %1610 = dma.vmem_to_hbm [thread:$0]  (%p1959_p3), %s1269_s8, 2048, %s1271_s9, %s1248_s10, %s1864_s26, %s1864_s26, %s1865_s4  }
 0x141   : > { %v1181_v3 = vadd.f32 %v1180_v2, %v1179_v27  ;;  %s1583_s0 = sshll.u32 %s1850_s19, 1  ;;  %s190_s30 = sand.u32 1, %s1826_s13  }
 0x142   : > { %s1281_s8 = sadd.s32 %s1846_s18, %s1583_s0  ;;  %s1412_s9 = sshll.u32 %s190_s30, 3 }
 0x143   : > { %v1182_v5 = vrot.slane %v1181_v3, 2  ;;  %s1584_s10 = sshll.u32 %s1281_s8, 3  ;;  %s2393_s24 = sld [smem:[#allocation11_spill]] }
 0x144   : > { %s192_s7 = scalar_lea.vmem [#allocation4], %s1412_s9  ;;  %s1253_s18 = scalar_lea.sflag [#allocation5], %s190_s30 }
 0x145   : > { %v1183_v6 = vadd.f32 %v1182_v5, %v1181_v3  ;;  %s1287_s19 = sshll.u32 %s192_s7, 4  ;;  %s1288_s19 = int_to_ptr.vmem [resolvable:$true] %s1287_s19 }
 0x147   : > { %v1184_v7 = vrot.slane %v1183_v6, 1 }
 0x149   : > { %v2297_v8 = vadd.f32 %v1184_v7, %v1183_v6  ;;  %s1285_s27 = scalar_lea.hbm %s2393_s24, %s1584_s10  ;;  %s1760_s9 = scalar_lea.hbm %s2393_s24, 32 }
 0x14a   : > { %s1289_s28 = sshll.u32 %s1285_s27, 4  ;;  %s1290_s28 = int_to_ptr.hbm [resolvable:$true] %s1289_s28 }
 0x14b   : > { %v1186_v10 = vmul.f32 0.0078125, %v2297_v8  ;;  %s1754_s26 = sshra.s32 %s1290_s28, 4  ;;  %s1755_s26 = int_to_ptr.hbm [resolvable:$true] %s1754_s26 }
 0x14c   : > { %s1756_s4 = scalar_lea.hbm %s1755_s26, 8  ;;  %p1761_p5 = scmp.lt.s32.totalorder %s1755_s26, %s2393_s24 }
 0x14d   : > { %v1187_v12 = vsub.f32 %v2197_v4, %v1186_v10  ;;  %v1188_v13 = vsub.f32 %v2203_v11, %v1186_v10  ;;  %v1189_v14 = vsub.f32 %v2207_v18, %v1186_v10  ;;  %v1190_v19 = vsub.f32 %v2211_v25, %v1186_v10  ;;  %p1757_p3 = scmp.ne.s32.totalorder %s1755_s26, %s1756_s4  ;;  %p1762_p2 = scmp.lt.s32.totalorder %s1760_s9, %s1756_s4 }
 0x14e   : > { %v1191_v20 = vsub.f32 %v2215_v33, %v1186_v10  ;;  %v1192_v23 = vsub.f32 %v2219_v40, %v1186_v10  ;;  %v1193_v29 = vsub.f32 %v2223_v47, %v1186_v10  ;;  %v1194_v11 = vsub.f32 %v2227_v53, %v1186_v10 }
 0x14f   : > { %v1203_v15 = vmul.f32 %v1187_v12, %v1187_v12  ;;  %v1204_v16 = vmul.f32 %v1188_v13, %v1188_v13  ;;  %v1205_v21 = vmul.f32 %v1189_v14, %v1189_v14  ;;  %v1206_v24 = vmul.f32 %v1190_v19, %v1190_v19  ;;  %p1758_p13 = pnand %p1757_p3, %p1998_p0  ;;  %p1763_p6 = por %p1762_p2, %p1761_p5 }
 0x150   : > { %v1207_v30 = vmul.f32 %v1191_v20, %v1191_v20  ;;  %v1208_v31 = vmul.f32 %v1192_v23, %v1192_v23  ;;  %v1195_v32 = vsub.f32 %v2231_v60, %v1186_v10  ;;  %v1209_v34 = vmul.f32 %v1193_v29, %v1193_v29 }
 0x151   : > { %v1219_v22 = vadd.f32 %v1204_v16, %v1203_v15  ;;  %v1196_v33 = vsub.f32 %v2235_v1, %v1186_v10  ;;  %v1210_v35 = vmul.f32 %v1194_v11, %v1194_v11  ;;  %v1197_v40 = vsub.f32 %v2239_v9, %v1186_v10  ;;  %p1759_p4 = pneg %p1758_p13 }
 0x152   : > { %v1211_v37 = vmul.f32 %v1195_v32, %v1195_v32  ;;  %v1198_v47 = vsub.f32 %v2243_v17, %v1186_v10  ;;  %v1199_v53 = vsub.f32 %v2250_v28, %v1186_v10  ;;  %v1200_v60 = vsub.f32 %v2258_v41, %v1186_v10 }
 0x153   : > { %v1220_v26 = vadd.f32 %v1219_v22, %v1205_v21  ;;  %v1212_v39 = vmul.f32 %v1196_v33, %v1196_v33  ;;  %v1213_v43 = vmul.f32 %v1197_v40, %v1197_v40  ;;  %v1201_v46 = vsub.f32 %v2268_v52, %v1186_v10  ;;  %p1764_p8 = pnand %p1763_p6, %p1759_p4 }
 0x154   : > { %v1214_v45 = vmul.f32 %v1198_v47, %v1198_v47  ;;  %v1215_v9 = vmul.f32 %v1199_v53, %v1199_v53  ;;  %v1202_v49 = vsub.f32 %v2280_v0, %v1186_v10  ;;  %v1216_v17 = vmul.f32 %v1200_v60, %v1200_v60 }
 0x155   : > { %v1221_v4 = vadd.f32 %v1220_v26, %v1206_v24  ;;  %v1217_v51 = vmul.f32 %v1201_v46, %v1201_v46  ;;  %v1240_v41 = vlaneseq }
 0x156   : > { %v1218_v28 = vmul.f32 %v1202_v49, %v1202_v49 }
 0x157   : > { %v1222_v18 = vadd.f32 %v1221_v4, %v1207_v30  ;;  %v1241_v59 = vshrl.u32 %v1240_v41, 7 }
 0x159   : > { %v1223_v25 = vadd.f32 %v1222_v18, %v1208_v31  ;;  %vm1243_vm4 = vcmp.eq.s32.totalorder %v1241_v59, 1  ;;  %vm1242_vm5 = vcmp.eq.s32.totalorder %v1241_v59, 0 }
 0x15b   : > { %v1224_v36 = vadd.f32 %v1223_v25, %v1209_v34 }
 0x15d   : > { %v1225_v38 = vadd.f32 %v1224_v36, %v1210_v35 }
 0x15f   : > { %v1226_v42 = vadd.f32 %v1225_v38, %v1211_v37 }
 0x161   : > { %v1227_v44 = vadd.f32 %v1226_v42, %v1212_v39 }
 0x163   : > { %v1228_v1 = vadd.f32 %v1227_v44, %v1213_v43 }
 0x165   : > { %v1229_v48 = vadd.f32 %v1228_v1, %v1214_v45 }
 0x167   : > { %v1230_v50 = vadd.f32 %v1229_v48, %v1215_v9 }
 0x169   : > { %v1231_v54 = vadd.f32 %v1230_v50, %v1216_v17 }
 0x16b   : > { %v1232_v55 = vadd.f32 %v1231_v54, %v1217_v51 }
 0x16d   : > { %v1233_v56 = vadd.f32 %v1232_v55, %v1218_v28 }
 0x16f   : > { %v1234_v57 = vrot.slane %v1233_v56, 4 }
 0x171   : > { %v1235_v58 = vadd.f32 %v1234_v57, %v1233_v56 }
 0x173   : > { %v1236_v52 = vrot.slane %v1235_v58, 2 }
 0x175   : > { %v1237_v61 = vadd.f32 %v1236_v52, %v1235_v58 }
 0x177   : > { %v1238_v62 = vrot.slane %v1237_v61, 1 }
 0x179   : > { %v1239_v63 = vadd.f32 %v1238_v62, %v1237_v61 }
 0x17b   : > { %v1244_v0 = vsel %vm1243_vm4, %v1239_v63, 0.0 }
 0x17c   : > { %v1245_v27 = vsel %vm1242_vm5, %v2297_v8, %v1244_v0 }
 0x17d   : > { %1246 = vst [vmem:[%s192_s7] sm:$0xff] %v1245_v27 }
 0x17e   : > { %1767 = shalt.err (!%p1764_p8)
}
 0x17f   : > { %1611 = dma.vmem_to_hbm [thread:$0]  (%p1998_p0), %s1288_s19, 128, %s1290_s28, %s1253_s18  }
 0x180 PF: > { %s2394_s30 = sld [smem:[#allocation8_spill]]  ;;  %p1621_p9 = scmp.ge.s32.totalorder %s1862_s22, 2 }
 0x182   : > { %p1615_p10 = pnand %p1621_p9, %p1974_p7 }
 0x184   : > { %p1616_p11 = pneg %p1615_p10 }
 0x186   : > { %s1301_s23 = sand.u32 1, %s2394_s30  }
 0x187   : > { %s1302_s27 = scalar_lea.sflag [#allocation3], %s1301_s23 }
 0x188   : > { %1813 = dma.done.wait (%p1616_p11), %s1302_s27, 2048  }
 0x189   : > { %1815 = vsyncadd (%p1616_p11), %s1302_s27, 4294965248  ;;  %s1311_s7 = sand.u32 1, %s1822_s12   ;;  %p1618_p12 = pnand %p1621_p9, %p2004_p1 }
 0x18a   : > { %s1312_s5 = scalar_lea.sflag [#allocation5], %s1311_s7 }
 0x18b   : > { %p1619_p3 = pneg %p1618_p12 }
 0x18d   : > { %1817 = dma.done.wait (%p1619_p3), %s1312_s5, 128  }
 0x18e   : > { %1819 = vsyncadd (%p1619_p3), %s1312_s5, 4294967168  ;;  %s20_s22 = sadd.s32 1, %s1862_s22   ;;  %s2395_s6 = smov %s1985_s15 }
 0x18f   : > { %p17_p0 = scmp.ge.s32.totalorder %s20_s22, 6   ;;  %s2396_s28 = sld [smem:[#allocation9_spill]] }
 0x190   : > { %s2397_s12 = smov %s1826_s13  ;;  %s2398_s13 = smov %s1830_s14 }
 0x191   : > { %s2399_s14 = smov %s1988_s3  ;;  %s2400_s15 = smov %s1838_s16 }
 0x192   : > { %s2401_s16 = smov %s1842_s17  ;;  %s2402_s17 = smov %s2395_s6 }
 0x193   : > { %s2403_s18 = smov %s1854_s20  ;;  %s2404_s19 = smov %s1858_s21 }
 0x194   : > { %s2405_s20 = smov %s2408_s25  ;;  %19 = sbr.rel (!%p17_p0) target bundleno = 12 (0xc), region = 85 }
 0x195   : > { %s2406_s21 = smov %s2396_s28 }
 0x199   :  { %1318 = vsyncpa [#allocation3], 1 }
 0x19a   :  { %1320 = vsyncpa [#allocation3 + $0x1], 1 }
 0x19b   :  { %1321 = vsyncpa [#allocation5], 1 }
 0x19c   :  { %1323 = vsyncpa [#allocation5 + $0x1], 1 }

</bundles_post_ra>
